<compile_context>
chip_gen: v7x
topology: tpu7x:2x2x1
jax: 0.10.0
libtpu: 0.0.40
codegen_flags: <defaults>
</compile_context>

<pallas_src>
import jax
import jax.numpy as jnp
from jax.experimental import pallas as pl
from jax.experimental.pallas import tpu as pltpu

_LANE = 128
_SUBLANE = 8


def _round_up(n, m):
    return ((n + m - 1) // m) * m


def _mlp_kernel(x_ref,
                w1, b1, w2, b2, w3, b3, w4, b4, w5, b5, w6, b6, w7, b7,
                o_ref):
    """y = relu(...relu(x@W1+b1)...)@W7 + b7 on one [bm, *] batch block.

    x / W are bf16 (MXU operands), matmuls accumulate in f32, bias add + ReLU
    run in f32, activations cast back to bf16 between layers. All lane dims are
    padded to multiples of 128, so every store is unmasked / lane-dense.
    """
    h = x_ref[...]                                          # bf16 [bm, in_p]
    hidden = ((w1, b1), (w2, b2), (w3, b3), (w4, b4), (w5, b5), (w6, b6))
    for w_ref, b_ref in hidden:
        y = jnp.dot(h, w_ref[...], preferred_element_type=jnp.float32)
        y = jnp.maximum(y + b_ref[...], 0.0)                # f32 bias + ReLU
        h = y.astype(jnp.bfloat16)                          # bf16 for next MXU op
    y = jnp.dot(h, w7[...], preferred_element_type=jnp.float32) + b7[...]
    o_ref[...] = y.astype(o_ref.dtype)


def make_perceptron_fwd(params, block_m=128):
    """Pack params once (transpose to [in,out], zero-pad lanes to 128, bf16-cast)
    and return a jitted forward function. params: list of (W[out,in], b[out])."""
    in_features = params[0][0].shape[1]
    out_features = params[-1][0].shape[0]
    in_p = _round_up(in_features, _LANE)
    out_p = _round_up(out_features, _LANE)

    packed = []
    for (w, b) in params:
        o_f, i_f = w.shape
        i_pad, o_pad = _round_up(i_f, _LANE), _round_up(o_f, _LANE)
        w_t = jnp.asarray(w, jnp.float32).T.astype(jnp.bfloat16)          # [in, out]
        w_p = jnp.zeros((i_pad, o_pad), jnp.bfloat16).at[:i_f, :o_f].set(w_t)
        b_p = jnp.zeros((1, o_pad), jnp.float32).at[0, :o_f].set(
            jnp.asarray(b, jnp.float32))
        packed.append((w_p, b_p))
    flat_params = [t for pair in packed for t in pair]
    max_width = max(wp.shape[1] for wp, _ in packed)

    # TODO(synk): if the middle layer (20*in_features) ever exceeds ~20-30 MiB of
    # weights, stream it in K/N chunks (extra grid axis or pltpu.emit_pipeline)
    # to respect v7x's 64 MiB VMEM.
    def _vmem_limit(bm):
        w_bytes = sum(wp.size * 2 + bp.size * 4 for wp, bp in packed)
        act_bytes = (2 * bm * in_p * 2            # double-buffered bf16 x blocks
                     + 2 * bm * out_p * 4         # double-buffered f32 out blocks
                     + 4 * bm * max_width * 4)    # intermediate activations
        return int(min(max(2 * (w_bytes + act_bytes), 16 << 20), 56 << 20))

    @jax.jit
    def fwd(x):
        B = x.shape[0]
        bm = block_m if B >= block_m else _round_up(B, _SUBLANE)
        b_pad = _round_up(B, bm)
        xp = jnp.zeros((b_pad, in_p), jnp.bfloat16)
        xp = xp.at[:B, :in_features].set(x.astype(jnp.bfloat16))

        weight_specs = []
        for wp, bp in packed:
            # Constant index_map -> weights/biases stay VMEM-resident across
            # grid steps (single buffer, no re-DMA per batch block).
            weight_specs.append(pl.BlockSpec(wp.shape, lambda i: (0, 0)))
            weight_specs.append(pl.BlockSpec(bp.shape, lambda i: (0, 0)))

        y_pad = pl.pallas_call(
            _mlp_kernel,
            out_shape=jax.ShapeDtypeStruct((b_pad, out_p), jnp.float32),
            grid=(b_pad // bm,),
            in_specs=[pl.BlockSpec((bm, in_p), lambda i: (i, 0))] + weight_specs,
            out_specs=pl.BlockSpec((bm, out_p), lambda i: (i, 0)),
            compiler_params=pltpu.CompilerParams(
                dimension_semantics=("parallel",),   # megacore / v7x 2nd TC
                vmem_limit_bytes=_vmem_limit(bm),
            ),
        )(xp, *flat_params)
        return y_pad[:B, :out_features].astype(x.dtype)

    return fwd


def init_params(key, in_features, out_features):
    """Deterministic PyTorch-style (kaiming-uniform-ish) init for each Linear."""
    dims = [
        (in_features, 3 * in_features),
        (3 * in_features, 20 * in_features),
        (20 * in_features, int(0.5 * out_features)),
        (int(0.5 * out_features), out_features),
        (out_features, int(1.5 * out_features)),
        (int(1.5 * out_features), int(1.3 * out_features)),
        (int(1.3 * out_features), out_features),
    ]
    params = []
    for (fan_in, fan_out) in dims:
        key, kw, kb = jax.random.split(key, 3)
        bound = 1.0 / (fan_in ** 0.5)
        w = jax.random.uniform(kw, (fan_out, fan_in), jnp.float32, -bound, bound)
        b = jax.random.uniform(kb, (fan_out,), jnp.float32, -bound, bound)
        params.append((w, b))
    return params


def reference_fwd(x, params, emulate_bf16=False):
    cast = ((lambda a: a.astype(jnp.bfloat16).astype(jnp.float32))
            if emulate_bf16 else (lambda a: a))
    h = cast(x.astype(jnp.float32))
    for i, (w, b) in enumerate(params):
        h = h @ cast(w).T + b
        if i < len(params) - 1:
            h = cast(jnp.maximum(h, 0.0))
    return h


if __name__ == "__main__":
    in_features = 16
    out_features = 40
    batch = 256   # exercises the batch grid: 2 blocks of 128 rows

    key = jax.random.PRNGKey(0)
    kx, kp = jax.random.split(key)
    x = jax.random.normal(kx, (batch, in_features), jnp.float32)
    params = init_params(kp, in_features, out_features)

    fwd = make_perceptron_fwd(params)
    out = jax.block_until_ready(fwd(x))

    ref_bf16 = reference_fwd(x, params, emulate_bf16=True)   # same arithmetic as kernel
    ref_f32 = reference_fwd(x, params, emulate_bf16=False)   # original f32 semantics
    assert out.shape == (batch, out_features), out.shape
    assert jnp.allclose(out, ref_bf16, atol=5e-3, rtol=5e-3), "mismatch vs bf16 reference"
    # f32 reference: allow bf16 weight-quantization error accumulated over 7 layers.
    rel = float(jnp.max(jnp.abs(out - ref_f32)) / (jnp.max(jnp.abs(ref_f32)) + 1e-6))
    assert rel < 0.15, f"too far from f32 reference: rel={rel}"

    print("KERNEL_OK")
</pallas_src>

<mosaic_0001>
module attributes {stable_mosaic.version = 11 : i64} {
  func.func @_mlp_kernel(%arg0: i32, %arg1: memref<128x128xbf16, #tpu.memory_space<vmem>>, %arg2: memref<128x128xbf16, #tpu.memory_space<vmem>>, %arg3: memref<1x128xf32, #tpu.memory_space<vmem>>, %arg4: memref<128x384xbf16, #tpu.memory_space<vmem>>, %arg5: memref<1x384xf32, #tpu.memory_space<vmem>>, %arg6: memref<384x128xbf16, #tpu.memory_space<vmem>>, %arg7: memref<1x128xf32, #tpu.memory_space<vmem>>, %arg8: memref<128x128xbf16, #tpu.memory_space<vmem>>, %arg9: memref<1x128xf32, #tpu.memory_space<vmem>>, %arg10: memref<128x128xbf16, #tpu.memory_space<vmem>>, %arg11: memref<1x128xf32, #tpu.memory_space<vmem>>, %arg12: memref<128x128xbf16, #tpu.memory_space<vmem>>, %arg13: memref<1x128xf32, #tpu.memory_space<vmem>>, %arg14: memref<128x128xbf16, #tpu.memory_space<vmem>>, %arg15: memref<1x128xf32, #tpu.memory_space<vmem>>, %arg16: memref<128x128xf32, #tpu.memory_space<vmem>>) attributes {dimension_semantics = [#tpu.dimension_semantics<parallel>], iteration_bounds = array<i64: 2>, scalar_prefetch = 0 : i64, scratch_operands = 0 : i64, tpu.core_type = #tpu.core_type<tc>, window_params = [{transform_indices = @transform_0, window_bounds = array<i64: 128, 128>}, {pipeline_mode = #tpu.pipeline_mode<synchronous>, transform_indices = @transform_1, window_bounds = array<i64: 128, 128>}, {pipeline_mode = #tpu.pipeline_mode<synchronous>, transform_indices = @transform_2, window_bounds = array<i64: 1, 128>}, {pipeline_mode = #tpu.pipeline_mode<synchronous>, transform_indices = @transform_3, window_bounds = array<i64: 128, 384>}, {pipeline_mode = #tpu.pipeline_mode<synchronous>, transform_indices = @transform_4, window_bounds = array<i64: 1, 384>}, {pipeline_mode = #tpu.pipeline_mode<synchronous>, transform_indices = @transform_5, window_bounds = array<i64: 384, 128>}, {pipeline_mode = #tpu.pipeline_mode<synchronous>, transform_indices = @transform_6, window_bounds = array<i64: 1, 128>}, {pipeline_mode = #tpu.pipeline_mode<synchronous>, transform_indices = @transform_7, window_bounds = array<i64: 128, 128>}, {pipeline_mode = #tpu.pipeline_mode<synchronous>, transform_indices = @transform_8, window_bounds = array<i64: 1, 128>}, {pipeline_mode = #tpu.pipeline_mode<synchronous>, transform_indices = @transform_9, window_bounds = array<i64: 128, 128>}, {pipeline_mode = #tpu.pipeline_mode<synchronous>, transform_indices = @transform_10, window_bounds = array<i64: 1, 128>}, {pipeline_mode = #tpu.pipeline_mode<synchronous>, transform_indices = @transform_11, window_bounds = array<i64: 128, 128>}, {pipeline_mode = #tpu.pipeline_mode<synchronous>, transform_indices = @transform_12, window_bounds = array<i64: 1, 128>}, {pipeline_mode = #tpu.pipeline_mode<synchronous>, transform_indices = @transform_13, window_bounds = array<i64: 128, 128>}, {pipeline_mode = #tpu.pipeline_mode<synchronous>, transform_indices = @transform_14, window_bounds = array<i64: 1, 128>}, {transform_indices = @transform_15, window_bounds = array<i64: 128, 128>}]} {
    %c0 = arith.constant 0 : index
    %c0_0 = arith.constant 0 : index
    %0 = vector.load %arg1[%c0, %c0_0] : memref<128x128xbf16, #tpu.memory_space<vmem>>, vector<128x128xbf16>
    %c0_1 = arith.constant 0 : index
    %c0_2 = arith.constant 0 : index
    %1 = vector.load %arg2[%c0_1, %c0_2] : memref<128x128xbf16, #tpu.memory_space<vmem>>, vector<128x128xbf16>
    %cst = arith.constant dense<0.000000e+00> : vector<128x128xf32>
    %2 = tpu.matmul %0, %1, %cst {dimension_numbers = #tpu.dot_dimension_numbers<[1], [0], [0], [1], [0, 0, 1, 1], [], []>} : vector<128x128xbf16>, vector<128x128xbf16>, vector<128x128xf32> -> vector<128x128xf32>
    %c0_3 = arith.constant 0 : index
    %c0_4 = arith.constant 0 : index
    %3 = vector.load %arg3[%c0_3, %c0_4] : memref<1x128xf32, #tpu.memory_space<vmem>>, vector<1x128xf32>
    %4 = vector.broadcast %3 : vector<1x128xf32> to vector<128x128xf32>
    %5 = arith.addf %2, %4 : vector<128x128xf32>
    %cst_5 = arith.constant 0.000000e+00 : f32
    %6 = vector.broadcast %cst_5 : f32 to vector<128x128xf32>
    %7 = arith.maximumf %5, %6 : vector<128x128xf32>
    %8 = arith.truncf %7 : vector<128x128xf32> to vector<128x128xbf16>
    %c0_6 = arith.constant 0 : index
    %c0_7 = arith.constant 0 : index
    %9 = vector.load %arg4[%c0_6, %c0_7] : memref<128x384xbf16, #tpu.memory_space<vmem>>, vector<128x384xbf16>
    %cst_8 = arith.constant dense<0.000000e+00> : vector<128x384xf32>
    %10 = tpu.matmul %8, %9, %cst_8 {dimension_numbers = #tpu.dot_dimension_numbers<[1], [0], [0], [1], [0, 0, 1, 1], [], []>} : vector<128x128xbf16>, vector<128x384xbf16>, vector<128x384xf32> -> vector<128x384xf32>
    %c0_9 = arith.constant 0 : index
    %c0_10 = arith.constant 0 : index
    %11 = vector.load %arg5[%c0_9, %c0_10] : memref<1x384xf32, #tpu.memory_space<vmem>>, vector<1x384xf32>
    %12 = vector.broadcast %11 : vector<1x384xf32> to vector<128x384xf32>
    %13 = arith.addf %10, %12 : vector<128x384xf32>
    %cst_11 = arith.constant 0.000000e+00 : f32
    %14 = vector.broadcast %cst_11 : f32 to vector<128x384xf32>
    %15 = arith.maximumf %13, %14 : vector<128x384xf32>
    %16 = arith.truncf %15 : vector<128x384xf32> to vector<128x384xbf16>
    %c0_12 = arith.constant 0 : index
    %c0_13 = arith.constant 0 : index
    %17 = vector.load %arg6[%c0_12, %c0_13] : memref<384x128xbf16, #tpu.memory_space<vmem>>, vector<384x128xbf16>
    %cst_14 = arith.constant dense<0.000000e+00> : vector<128x128xf32>
    %18 = tpu.matmul %16, %17, %cst_14 {dimension_numbers = #tpu.dot_dimension_numbers<[1], [0], [0], [1], [0, 0, 1, 1], [], []>} : vector<128x384xbf16>, vector<384x128xbf16>, vector<128x128xf32> -> vector<128x128xf32>
    %c0_15 = arith.constant 0 : index
    %c0_16 = arith.constant 0 : index
    %19 = vector.load %arg7[%c0_15, %c0_16] : memref<1x128xf32, #tpu.memory_space<vmem>>, vector<1x128xf32>
    %20 = vector.broadcast %19 : vector<1x128xf32> to vector<128x128xf32>
    %21 = arith.addf %18, %20 : vector<128x128xf32>
    %cst_17 = arith.constant 0.000000e+00 : f32
    %22 = vector.broadcast %cst_17 : f32 to vector<128x128xf32>
    %23 = arith.maximumf %21, %22 : vector<128x128xf32>
    %24 = arith.truncf %23 : vector<128x128xf32> to vector<128x128xbf16>
    %c0_18 = arith.constant 0 : index
    %c0_19 = arith.constant 0 : index
    %25 = vector.load %arg8[%c0_18, %c0_19] : memref<128x128xbf16, #tpu.memory_space<vmem>>, vector<128x128xbf16>
    %cst_20 = arith.constant dense<0.000000e+00> : vector<128x128xf32>
    %26 = tpu.matmul %24, %25, %cst_20 {dimension_numbers = #tpu.dot_dimension_numbers<[1], [0], [0], [1], [0, 0, 1, 1], [], []>} : vector<128x128xbf16>, vector<128x128xbf16>, vector<128x128xf32> -> vector<128x128xf32>
    %c0_21 = arith.constant 0 : index
    %c0_22 = arith.constant 0 : index
    %27 = vector.load %arg9[%c0_21, %c0_22] : memref<1x128xf32, #tpu.memory_space<vmem>>, vector<1x128xf32>
    %28 = vector.broadcast %27 : vector<1x128xf32> to vector<128x128xf32>
    %29 = arith.addf %26, %28 : vector<128x128xf32>
    %cst_23 = arith.constant 0.000000e+00 : f32
    %30 = vector.broadcast %cst_23 : f32 to vector<128x128xf32>
    %31 = arith.maximumf %29, %30 : vector<128x128xf32>
    %32 = arith.truncf %31 : vector<128x128xf32> to vector<128x128xbf16>
    %c0_24 = arith.constant 0 : index
    %c0_25 = arith.constant 0 : index
    %33 = vector.load %arg10[%c0_24, %c0_25] : memref<128x128xbf16, #tpu.memory_space<vmem>>, vector<128x128xbf16>
    %cst_26 = arith.constant dense<0.000000e+00> : vector<128x128xf32>
    %34 = tpu.matmul %32, %33, %cst_26 {dimension_numbers = #tpu.dot_dimension_numbers<[1], [0], [0], [1], [0, 0, 1, 1], [], []>} : vector<128x128xbf16>, vector<128x128xbf16>, vector<128x128xf32> -> vector<128x128xf32>
    %c0_27 = arith.constant 0 : index
    %c0_28 = arith.constant 0 : index
    %35 = vector.load %arg11[%c0_27, %c0_28] : memref<1x128xf32, #tpu.memory_space<vmem>>, vector<1x128xf32>
    %36 = vector.broadcast %35 : vector<1x128xf32> to vector<128x128xf32>
    %37 = arith.addf %34, %36 : vector<128x128xf32>
    %cst_29 = arith.constant 0.000000e+00 : f32
    %38 = vector.broadcast %cst_29 : f32 to vector<128x128xf32>
    %39 = arith.maximumf %37, %38 : vector<128x128xf32>
    %40 = arith.truncf %39 : vector<128x128xf32> to vector<128x128xbf16>
    %c0_30 = arith.constant 0 : index
    %c0_31 = arith.constant 0 : index
    %41 = vector.load %arg12[%c0_30, %c0_31] : memref<128x128xbf16, #tpu.memory_space<vmem>>, vector<128x128xbf16>
    %cst_32 = arith.constant dense<0.000000e+00> : vector<128x128xf32>
    %42 = tpu.matmul %40, %41, %cst_32 {dimension_numbers = #tpu.dot_dimension_numbers<[1], [0], [0], [1], [0, 0, 1, 1], [], []>} : vector<128x128xbf16>, vector<128x128xbf16>, vector<128x128xf32> -> vector<128x128xf32>
    %c0_33 = arith.constant 0 : index
    %c0_34 = arith.constant 0 : index
    %43 = vector.load %arg13[%c0_33, %c0_34] : memref<1x128xf32, #tpu.memory_space<vmem>>, vector<1x128xf32>
    %44 = vector.broadcast %43 : vector<1x128xf32> to vector<128x128xf32>
    %45 = arith.addf %42, %44 : vector<128x128xf32>
    %cst_35 = arith.constant 0.000000e+00 : f32
    %46 = vector.broadcast %cst_35 : f32 to vector<128x128xf32>
    %47 = arith.maximumf %45, %46 : vector<128x128xf32>
    %48 = arith.truncf %47 : vector<128x128xf32> to vector<128x128xbf16>
    %c0_36 = arith.constant 0 : index
    %c0_37 = arith.constant 0 : index
    %49 = vector.load %arg14[%c0_36, %c0_37] : memref<128x128xbf16, #tpu.memory_space<vmem>>, vector<128x128xbf16>
    %cst_38 = arith.constant dense<0.000000e+00> : vector<128x128xf32>
    %50 = tpu.matmul %48, %49, %cst_38 {dimension_numbers = #tpu.dot_dimension_numbers<[1], [0], [0], [1], [0, 0, 1, 1], [], []>} : vector<128x128xbf16>, vector<128x128xbf16>, vector<128x128xf32> -> vector<128x128xf32>
    %c0_39 = arith.constant 0 : index
    %c0_40 = arith.constant 0 : index
    %51 = vector.load %arg15[%c0_39, %c0_40] : memref<1x128xf32, #tpu.memory_space<vmem>>, vector<1x128xf32>
    %52 = vector.broadcast %51 : vector<1x128xf32> to vector<128x128xf32>
    %53 = arith.addf %50, %52 : vector<128x128xf32>
    %c0_41 = arith.constant 0 : index
    %c0_42 = arith.constant 0 : index
    %54 = vector.load %arg16[%c0_41, %c0_42] : memref<128x128xf32, #tpu.memory_space<vmem>>, vector<128x128xf32>
    tpu.vector_store %arg16[%c0_41, %c0_42], %53 {strides = array<i32>} : memref<128x128xf32, #tpu.memory_space<vmem>>, vector<128x128xf32>,
    return
  }
  func.func @transform_0(%arg0: i32) -> (i32, i32) {
    %c0_i32 = arith.constant 0 : i32
    %c0_i32_0 = arith.constant 0 : i32
    return %arg0, %c0_i32 : i32, i32
  }
  func.func @transform_1(%arg0: i32) -> (i32, i32) {
    %c0_i32 = arith.constant 0 : i32
    %c0_i32_0 = arith.constant 0 : i32
    %c0_i32_1 = arith.constant 0 : i32
    return %c0_i32, %c0_i32_0 : i32, i32
  }
  func.func @transform_2(%arg0: i32) -> (i32, i32) {
    %c0_i32 = arith.constant 0 : i32
    %c0_i32_0 = arith.constant 0 : i32
    %c0_i32_1 = arith.constant 0 : i32
    return %c0_i32, %c0_i32_0 : i32, i32
  }
  func.func @transform_3(%arg0: i32) -> (i32, i32) {
    %c0_i32 = arith.constant 0 : i32
    %c0_i32_0 = arith.constant 0 : i32
    %c0_i32_1 = arith.constant 0 : i32
    return %c0_i32, %c0_i32_0 : i32, i32
  }
  func.func @transform_4(%arg0: i32) -> (i32, i32) {
    %c0_i32 = arith.constant 0 : i32
    %c0_i32_0 = arith.constant 0 : i32
    %c0_i32_1 = arith.constant 0 : i32
    return %c0_i32, %c0_i32_0 : i32, i32
  }
  func.func @transform_5(%arg0: i32) -> (i32, i32) {
    %c0_i32 = arith.constant 0 : i32
    %c0_i32_0 = arith.constant 0 : i32
    %c0_i32_1 = arith.constant 0 : i32
    return %c0_i32, %c0_i32_0 : i32, i32
  }
  func.func @transform_6(%arg0: i32) -> (i32, i32) {
    %c0_i32 = arith.constant 0 : i32
    %c0_i32_0 = arith.constant 0 : i32
    %c0_i32_1 = arith.constant 0 : i32
    return %c0_i32, %c0_i32_0 : i32, i32
  }
  func.func @transform_7(%arg0: i32) -> (i32, i32) {
    %c0_i32 = arith.constant 0 : i32
    %c0_i32_0 = arith.constant 0 : i32
    %c0_i32_1 = arith.constant 0 : i32
    return %c0_i32, %c0_i32_0 : i32, i32
  }
  func.func @transform_8(%arg0: i32) -> (i32, i32) {
    %c0_i32 = arith.constant 0 : i32
    %c0_i32_0 = arith.constant 0 : i32
    %c0_i32_1 = arith.constant 0 : i32
    return %c0_i32, %c0_i32_0 : i32, i32
  }
  func.func @transform_9(%arg0: i32) -> (i32, i32) {
    %c0_i32 = arith.constant 0 : i32
    %c0_i32_0 = arith.constant 0 : i32
    %c0_i32_1 = arith.constant 0 : i32
    return %c0_i32, %c0_i32_0 : i32, i32
  }
  func.func @transform_10(%arg0: i32) -> (i32, i32) {
    %c0_i32 = arith.constant 0 : i32
    %c0_i32_0 = arith.constant 0 : i32
    %c0_i32_1 = arith.constant 0 : i32
    return %c0_i32, %c0_i32_0 : i32, i32
  }
  func.func @transform_11(%arg0: i32) -> (i32, i32) {
    %c0_i32 = arith.constant 0 : i32
    %c0_i32_0 = arith.constant 0 : i32
    %c0_i32_1 = arith.constant 0 : i32
    return %c0_i32, %c0_i32_0 : i32, i32
  }
  func.func @transform_12(%arg0: i32) -> (i32, i32) {
    %c0_i32 = arith.constant 0 : i32
    %c0_i32_0 = arith.constant 0 : i32
    %c0_i32_1 = arith.constant 0 : i32
    return %c0_i32, %c0_i32_0 : i32, i32
  }
  func.func @transform_13(%arg0: i32) -> (i32, i32) {
    %c0_i32 = arith.constant 0 : i32
    %c0_i32_0 = arith.constant 0 : i32
    %c0_i32_1 = arith.constant 0 : i32
    return %c0_i32, %c0_i32_0 : i32, i32
  }
  func.func @transform_14(%arg0: i32) -> (i32, i32) {
    %c0_i32 = arith.constant 0 : i32
    %c0_i32_0 = arith.constant 0 : i32
    %c0_i32_1 = arith.constant 0 : i32
    return %c0_i32, %c0_i32_0 : i32, i32
  }
  func.func @transform_15(%arg0: i32) -> (i32, i32) {
    %c0_i32 = arith.constant 0 : i32
    %c0_i32_0 = arith.constant 0 : i32
    return %arg0, %c0_i32 : i32, i32
  }
}

</mosaic_0001>

<bundles_post_ra>
// kernel: fwd.1
= control target key start
LH: loop header
LB: loop body
LE: loop exit
PB: predicated region body
PF: predicated region fallthrough
CT: control target
= control target key end

     0   :  { %s3178_s18 = smov 0   ;;  %s3638_s0 = inlined_call_operand.vmem [shape: bf16[256,128], index: 0, kind: input, shape index: {}]   ;;  %s3639_s1 = inlined_call_operand.vmem [shape: bf16[128,128], index: 1, kind: input, shape index: {}]   ;;  %s3640_s2 = inlined_call_operand.vmem [shape: f32[1,128], index: 2, kind: input, shape index: {}]   ;;  %s3641_s3 = inlined_call_operand.vmem [shape: bf16[128,384], index: 3, kind: input, shape index: {}]   ;;  %s3642_s4 = inlined_call_operand.vmem [shape: f32[1,384], index: 4, kind: input, shape index: {}]   ;;  %s3643_s5 = inlined_call_operand.vmem [shape: bf16[384,128], index: 5, kind: input, shape index: {}]   ;;  %s3644_s6 = inlined_call_operand.vmem [shape: f32[1,128], index: 6, kind: input, shape index: {}]   ;;  %s3645_s7 = inlined_call_operand.vmem [shape: bf16[128,128], index: 7, kind: input, shape index: {}]   ;;  %s3646_s8 = inlined_call_operand.vmem [shape: f32[1,128], index: 8, kind: input, shape index: {}]   ;;  %s3647_s9 = inlined_call_operand.vmem [shape: bf16[128,128], index: 9, kind: input, shape index: {}]   ;;  %s3648_s10 = inlined_call_operand.vmem [shape: f32[1,128], index: 10, kind: input, shape index: {}]   ;;  %s3649_s11 = inlined_call_operand.vmem [shape: bf16[128,128], index: 11, kind: input, shape index: {}]   ;;  %s3650_s12 = inlined_call_operand.vmem [shape: f32[1,128], index: 12, kind: input, shape index: {}]   ;;  %s3651_s13 = inlined_call_operand.vmem [shape: bf16[128,128], index: 13, kind: input, shape index: {}]   ;;  %s3652_s14 = inlined_call_operand.vmem [shape: f32[1,128], index: 14, kind: input, shape index: {}]   ;;  %s3653_s15 = inlined_call_operand.vmem [shape: f32[256,128], index: 15, kind: output, shape index: {}]  }
   0x1 LB: > { %s2447_s19 = sadd.s32 4294967295, %s3095_s18   ;;  %p2451_p0 = scmp.ge.s32.totalorder %s3095_s18, 1  ;;  %s3095_s18 = sphi %s3178_s18, %s25_s18  }
   0x2   : > { %p438_p1 = scmp.lt.s32.totalorder %s3095_s18, 3 }
   0x4   : > { %p439_p2 = pnand %p2451_p0, %p438_p1 }
   0x5   : > { %v2985_v0 = vld [vmem:[%s3639_s1] sm:$0xff] (!%p439_p2)   ;;  %s2452_s22 = sshll.u32 (!%p439_p2), %s2447_s19, 4  ;;  %v2986_v1 = vld [vmem:[%s3639_s1 + $0x8] sm:$0xff] (!%p439_p2)   ;;  %v2987_v2 = vld [vmem:[%s3639_s1 + $0x10] sm:$0xff] (!%p439_p2)   ;;  %v3097_v40 = vmov (!%p439_p2), 0  }
   0x6   : > { %442 = sbr.rel (%p439_p2) target bundleno = 1646 (0x66e), region = 80  ;;  %p487_p3 = scmp.lt.s32.totalorder (!%p439_p2), %s2452_s22, 31  ;;  %2736 = vmatprep.subr.bf16.mxu0 (!%p439_p2), %v2985_v0  ;;  %v2988_v3 = vld [vmem:[%s3639_s1 + $0x18] sm:$0xff] (!%p439_p2)   ;;  %v2989_v5 = vld [vmem:[%s3639_s1 + $0x20] sm:$0xff] (!%p439_p2)   ;;  %v2990_v6 = vld [vmem:[%s3639_s1 + $0x28] sm:$0xff] (!%p439_p2)   ;;  %964 = vmatprep.mubr.bf16.mxu1 (!%p439_p2), %v3097_v40 }
   0x7   : > { %2737 = vmatpush3.bf16.msra.mxu0 (!%p439_p2), %v2985_v0  ;;  %v3001_v7 = vld [vmem:[%s3641_s3 + $0x4] ss:$12 sps:$4 sm:$0xff] (!%p439_p2)   ;;  %v3003_v8 = vld [vmem:[%s3641_s3] ss:$12 sps:$4 sm:$0xff] (!%p439_p2)   ;;  %v3005_v9 = vld [vmem:[%s3641_s3 + $0x1c] ss:$12 sps:$4 sm:$0xff] (!%p439_p2)  }
   0x8   : > { %2738 = vmatprep.subr.bf16.mxu0 (!%p439_p2), %v2986_v1  ;;  %932 = vmatprep.subr.bf16.mxu1 (!%p439_p2), %v3001_v7  ;;  %v3007_v10 = vld [vmem:[%s3641_s3 + $0x18] ss:$12 sps:$4 sm:$0xff] (!%p439_p2)   ;;  %v2991_v11 = vld [vmem:[%s3639_s1 + $0x30] sm:$0xff] (!%p439_p2)   ;;  %v3008_v21 = vld [vmem:[%s3641_s3 + $0x20] ss:$12 sps:$4 sm:$0xff] (!%p439_p2)  }
   0x9   : > { %933 = vmatpush1.bf16.msra.mxu1 (!%p439_p2), %v3003_v8  ;;  %v3009_v12 = vld [vmem:[%s3641_s3 + $0x34] ss:$12 sps:$4 sm:$0xff] (!%p439_p2)   ;;  %v2992_v13 = vld [vmem:[%s3639_s1 + $0x38] sm:$0xff] (!%p439_p2)   ;;  %v3017_v19 = vld [vmem:[%s3641_s3 + $0x64] ss:$12 sps:$4 sm:$0xff] (!%p439_p2)  }
   0xa   : > { %934 = vmatprep.subr.bf16.mxu1 (!%p439_p2), %v3005_v9  ;;  %v3011_v14 = vld [vmem:[%s3641_s3 + $0x30] ss:$12 sps:$4 sm:$0xff] (!%p439_p2)   ;;  %v3013_v15 = vld [vmem:[%s3641_s3 + $0x4c] ss:$12 sps:$4 sm:$0xff] (!%p439_p2)   ;;  %v3015_v16 = vld [vmem:[%s3641_s3 + $0x48] ss:$12 sps:$4 sm:$0xff] (!%p439_p2)  }
   0xb   : > { %2739 = vmatpush3.bf16.msra.mxu0 (!%p439_p2), %v2986_v1  ;;  %v3004_v18 = vld [vmem:[%s3641_s3 + $0x8] ss:$12 sps:$4 sm:$0xff] (!%p439_p2)   ;;  %v3019_v22 = vld [vmem:[%s3641_s3 + $0x60] ss:$12 sps:$4 sm:$0xff] (!%p439_p2)   ;;  %v3012_v24 = vld [vmem:[%s3641_s3 + $0x38] ss:$12 sps:$4 sm:$0xff] (!%p439_p2)  }
   0xc   : > { %2740 = vmatprep.subr.bf16.mxu0 (!%p439_p2), %v2987_v2  ;;  %v3021_v23 = vld [vmem:[%s3641_s3 + $0x7c] ss:$12 sps:$4 sm:$0xff] (!%p439_p2)   ;;  %v3023_v25 = vld [vmem:[%s3641_s3 + $0x78] ss:$12 sps:$4 sm:$0xff] (!%p439_p2)   ;;  %v3024_v32 = vld [vmem:[%s3641_s3 + $0x80] ss:$12 sps:$4 sm:$0xff] (!%p439_p2)  }
   0xd   : > { %s3655_s22 = smov (!%p487_p3, %s2452_s22), 31  ;;  %935 = vmatpush1.bf16.msra.mxu1 %v3007_v10  ;;  %v3016_v28 = vld [vmem:[%s3641_s3 + $0x50] ss:$12 sps:$4 sm:$0xff]   ;;  %v3020_v29 = vld [vmem:[%s3641_s3 + $0x68] ss:$12 sps:$4 sm:$0xff]   ;;  %v3033_v41 = vld [vmem:[%s3643_s5 + $0x40] sm:$0xff]  }
   0xe   : > { %s2453_s27 = sshll.u32 %s3655_s22, 2  ;;  %936 = vmatprep.subr.bf16.mxu1 %v3009_v12  ;;  %v3025_v34 = vld [vmem:[%s3641_s3 + $0x94] ss:$12 sps:$4 sm:$0xff]   ;;  %v3027_v35 = vld [vmem:[%s3641_s3 + $0x90] ss:$12 sps:$4 sm:$0xff]   ;;  %v3036_v62 = vld [vmem:[%s3643_s5 + $0x48] sm:$0xff]  }
   0xf   : > { %s3201_s30 = scalar_lea.vmem %s3638_s0, %s2453_s27  ;;  %2741 = vmatpush3.bf16.msra.mxu0 %v2987_v2  ;;  %v3028_v36 = vld [vmem:[%s3641_s3 + $0x98] ss:$12 sps:$4 sm:$0xff]   ;;  %v3031_v38 = vld [vmem:[%s3641_s3 + $0xa8] ss:$12 sps:$4 sm:$0xff]   ;;  %v3032_v39 = vld [vmem:[%s3641_s3 + $0xb0] ss:$12 sps:$4 sm:$0xff]  }
  0x10   : > { %v2993_v4 = vld [vmem:[%s3201_s30] sm:$0xff]   ;;  %2742 = vmatprep.subr.bf16.mxu0 %v2988_v3  ;;  %v2994_v17 = vld [vmem:[%s3201_s30 + $0x8] sm:$0xff]   ;;  %v2995_v20 = vld [vmem:[%s3201_s30 + $0x10] sm:$0xff]  }
  0x11   : > { %2752 = vmatprep.mubr.bf16.mxu0 %v2993_v4  ;;  %937 = vmatpush1.bf16.msra.mxu1 %v3011_v14  ;;  %v2996_v26 = vld [vmem:[%s3201_s30 + $0x18] sm:$0xff]   ;;  %v2997_v27 = vld [vmem:[%s3201_s30 + $0x20] sm:$0xff]   ;;  %v2998_v30 = vld [vmem:[%s3201_s30 + $0x28] sm:$0xff]  }
  0x12   : > { %938 = vmatprep.subr.bf16.mxu1 %v3013_v15  ;;  %v2999_v31 = vld [vmem:[%s3201_s30 + $0x30] sm:$0xff]   ;;  %v3000_v33 = vld [vmem:[%s3201_s30 + $0x38] sm:$0xff]   ;;  %v3035_v42 = vld [vmem:[%s3643_s5 + $0x80] sm:$0xff]   ;;  %s2455_s30 = sshll.u32 %s3655_s22, 3 }
  0x13   : > { %2743 = vmatpush3.bf16.msra.mxu0 %v2988_v3  ;;  %v3029_v37 = vld [vmem:[%s3641_s3 + $0xac] ss:$12 sps:$4 sm:$0xff]   ;;  %v3308_v43 = vld [vmem:[%s3640_s2] ss:$0 sm:$0xff]  ;;  %v3039_v9 = vld [vmem:[%s3643_s5 + $0x50] sm:$0xff]   ;;  %s3617_s26 = scalar_lea.vmem %s3653_s15, %s2455_s30 }
  0x14   : > { %2744 = vmatprep.subr.bf16.mxu0 %v2989_v5  ;;  %v3034_v59 = vld [vmem:[%s3643_s5] sm:$0xff]   ;;  %v3038_v63 = vld [vmem:[%s3643_s5 + $0x88] sm:$0xff]   ;;  %v3041_v10 = vld [vmem:[%s3643_s5 + $0x90] sm:$0xff]  }
  0x15   : > { %939 = vmatpush1.bf16.msra.mxu1 %v3015_v16  ;;  %v3037_v7 = vld [vmem:[%s3643_s5 + $0x8] sm:$0xff]   ;;  %v3040_v15 = vld [vmem:[%s3643_s5 + $0x10] sm:$0xff]  }
  0x16   : > { %940 = vmatprep.subr.bf16.mxu1 %v3017_v19  ;;  %v3044_v19 = vld [vmem:[%s3643_s5 + $0x98] sm:$0xff]  }
  0x17   : > { %2745 = vmatpush3.bf16.msra.mxu0 %v2989_v5 }
  0x18   : > { %2746 = vmatprep.subr.bf16.mxu0 %v2990_v6 }
  0x19   : > { %941 = vmatpush1.bf16.msra.mxu1 %v3019_v22 }
  0x1a   : > { %942 = vmatprep.subr.bf16.mxu1 %v3021_v23 }
  0x1b   : > { %2747 = vmatpush3.bf16.msra.mxu0 %v2990_v6 }
  0x1c   : > { %2748 = vmatprep.subr.bf16.mxu0 %v2991_v11 }
  0x1d   : > { %943 = vmatpush1.bf16.msra.mxu1 %v3023_v25 }
  0x1e   : > { %944 = vmatprep.subr.bf16.mxu1 %v3025_v34 }
  0x1f   : > { %2749 = vmatpush3.bf16.msra.mxu0 %v2991_v11 }
  0x20   : > { %2750 = vmatprep.subr.bf16.mxu0 %v2992_v13 }
  0x21   : > { %945 = vmatpush1.bf16.msra.mxu1 %v3027_v35  ;;  %v3046_v35 = vld [vmem:[%s3643_s5 + $0x20] sm:$0xff]  }
  0x22   : > { %946 = vmatprep.subr.bf16.mxu1 %v3029_v37 }
  0x23   : > { %2751 = vmatpush3.bf16.msra.mxu0 %v2992_v13 }
  0x24   : > { %2768 = vmatprep.subr.bf16.mxu0 %v3004_v18 }
  0x25   : > { %947 = vmatpush1.bf16.msra.mxu1 %v3031_v38  ;;  %v3048_v38 = vld [vmem:[%s3643_s5 + $0x68] sm:$0xff]  }
  0x26   : > { %2753 = vmatmul.mubr.bf16.vlgmr.msra.gmra.mrb[0].mxu0 %v2994_v17  ;;  %2800 = vmatprep.subr.bf16.mxu1 %v3035_v42 }
  0x27   : > { %2756 = vmatprep.mubr.bf16.mxu0 %v2995_v20  ;;  %2769 = vmatpush3.bf16.msra.mxu0 %v3004_v18  ;;  %v3042_v18 = vld [vmem:[%s3643_s5 + $0x58] sm:$0xff]  }
  0x28   : > { %2770 = vmatprep.subr.bf16.mxu0 %v3008_v21 }
  0x2b   : > { %2771 = vmatpush3.bf16.msra.mxu0 %v3008_v21 }
  0x2c   : > { %2772 = vmatprep.subr.bf16.mxu0 %v3012_v24 }
  0x2e   : > { %2757 = vmatmul.mubr.bf16.gmra.mrb[4].mxu0 %v2996_v26 }
  0x2f   : > { %2760 = vmatprep.mubr.bf16.mxu0 %v2997_v27  ;;  %2773 = vmatpush3.bf16.msra.mxu0 %v3012_v24  ;;  %v3043_v27 = vld [vmem:[%s3643_s5 + $0x18] sm:$0xff]  }
  0x30   : > { %2774 = vmatprep.subr.bf16.mxu0 %v3016_v28 }
  0x33   : > { %2775 = vmatpush3.bf16.msra.mxu0 %v3016_v28 }
  0x34   : > { %2776 = vmatprep.subr.bf16.mxu0 %v3020_v29 }
  0x36   : > { %2761 = vmatmul.mubr.bf16.gmra.mrb[8].mxu0 %v2998_v30  ;;  %v3047_v30 = vld [vmem:[%s3643_s5 + $0xa0] sm:$0xff]  }
  0x37   : > { %2764 = vmatprep.mubr.bf16.mxu0 %v2999_v31  ;;  %2777 = vmatpush3.bf16.msra.mxu0 %v3020_v29  ;;  %v3045_v29 = vld [vmem:[%s3643_s5 + $0x60] sm:$0xff]  }
  0x38   : > { %2778 = vmatprep.subr.bf16.mxu0 %v3024_v32 }
  0x3b   : > { %2779 = vmatpush3.bf16.msra.mxu0 %v3024_v32 }
  0x3c   : > { %2780 = vmatprep.subr.bf16.mxu0 %v3028_v36 }
  0x3e   : > { %2765 = vmatmul.mubr.bf16.gmra.mrb[12].mxu0 %v3000_v33 }
  0x3f   : > { %2781 = vmatpush3.bf16.msra.mxu0 %v3028_v36 }
  0x40   : > { %2782 = vmatprep.subr.bf16.mxu0 %v3032_v39 }
  0x43   : > { %2783 = vmatpush3.bf16.msra.mxu0 %v3032_v39 }
  0x44   : > { %2592 = vmatprep.subr.bf16.mxu0 %v3033_v41 }
  0xf9   : > { %v2754_v44 = vpop.f32.mrb[0].mxu0 }
  0xfa   : > { %v677_v45 = vadd.f32 %v2754_v44, %v3308_v43  ;;  %v668_v46 = vpop.f32.mrb[1].mxu0 }
  0xfb   : > { %v669_v47 = vadd.f32 %v3308_v43, %v668_v46  ;;  %v2755_v48 = vpop.f32.mrb[2].mxu0 }
  0xfc   : > { %v680_v49 = vadd.f32 %v2755_v48, %v3308_v43  ;;  %v671_v50 = vpop.f32.mrb[3].mxu0  ;;  %v733_v52 = vmax.f32 %v677_v45, 0.0  ;;  %v3049_v48 = vld [vmem:[%s3643_s5 + $0x28] sm:$0xff]  }
  0xfd   : > { %v672_v51 = vadd.f32 %v3308_v43, %v671_v50  ;;  %v731_v54 = vmax.f32 %v669_v47, 0.0 }
  0xfe   : > { %v734_v53 = vmax.f32 %v680_v49, 0.0 }
  0xff   : > { %v732_v55 = vmax.f32 %v672_v51, 0.0 }
 0x100   : > { %v748_v56 = vpack.c.bf16 %v734_v53, %v733_v52  ;;  %v3051_v53 = vld [vmem:[%s3643_s5 + $0x70] sm:$0xff]  }
 0x101   : > { %v747_v57 = vpack.c.bf16 %v732_v55, %v731_v54  ;;  %v2758_v58 = vpop.f32.mrb[4].mxu0  ;;  %v3052_v54 = vld [vmem:[%s3643_s5 + $0x30] sm:$0xff]  }
 0x102   : > { %v693_v60 = vadd.f32 %v2758_v58, %v3308_v43  ;;  %v684_v61 = vpop.f32.mrb[5].mxu0  ;;  %v3053_v55 = vld [vmem:[%s3643_s5 + $0xb0] sm:$0xff]   ;;  %v3402_v58 = vld [vmem:[%s3645_s7] sm:$0xff]  }
 0x103   : > { %v685_v0 = vadd.f32 %v3308_v43, %v684_v61  ;;  %v2759_v1 = vpop.f32.mrb[6].mxu0  ;;  %965 = vmatmul.mubr.bf16.vlgmr.msra.gmra.mrb[0].mxu1 %v747_v57  ;;  %2784 = vmatprep.mubr.bf16.mxu0 %v747_v57  ;;  %v3056_v57 = vld [vmem:[%s3643_s5 + $0xb8] sm:$0xff]  }
 0x104   : > { %v737_v2 = vmax.f32 %v693_v60, 0.0  ;;  %v696_v3 = vadd.f32 %v2759_v1, %v3308_v43  ;;  %v687_v4 = vpop.f32.mrb[7].mxu0  ;;  %2785 = vmatmul.mubr.bf16.vlgmr.msra.gmra.mrb[16].mxu0 %v748_v56  ;;  %974 = vmatprep.mubr.bf16.mxu1 %v3097_v40 }
 0x105   : > { %v735_v5 = vmax.f32 %v685_v0, 0.0  ;;  %v688_v6 = vadd.f32 %v3308_v43, %v687_v4  ;;  %2593 = vmatpush3.bf16.msra.mxu0 %v3034_v59  ;;  %2801 = vmatpush3.bf16.msra.mxu1 %v3035_v42  ;;  %v789_v59 = vlaneseq }
 0x106   : > { %v738_v8 = vmax.f32 %v696_v3, 0.0  ;;  %2594 = vmatprep.subr.bf16.mxu0 %v3036_v62  ;;  %2802 = vmatprep.subr.bf16.mxu1 %v3038_v63  ;;  %v787_v62 = vld [vmem:[%s3642_s4] sm:$0x7] }
 0x107   : > { %v736_v11 = vmax.f32 %v688_v6, 0.0  ;;  %v790_v60 = vshrl.u32 %v789_v59, 7 }
 0x108   : > { %v750_v12 = vpack.c.bf16 %v738_v8, %v737_v2 }
 0x109   : > { %v749_v13 = vpack.c.bf16 %v736_v11, %v735_v5  ;;  %v2762_v14 = vpop.f32.mrb[8].mxu0  ;;  %2595 = vmatpush3.bf16.msra.mxu0 %v3037_v7  ;;  %2803 = vmatpush3.bf16.msra.mxu1 %v3038_v63  ;;  %v791_v61 = vsub.s32 0, %v790_v60  ;;  %v795_v63 = vsub.s32 1, %v790_v60  ;;  %v799_v0 = vsub.s32 2, %v790_v60 }
 0x10a   : > { %v709_v16 = vadd.f32 %v2762_v14, %v3308_v43  ;;  %v700_v17 = vpop.f32.mrb[9].mxu0  ;;  %2596 = vmatprep.subr.bf16.mxu0 %v3039_v9  ;;  %2804 = vmatprep.subr.bf16.mxu1 %v3041_v10 }
 0x10b   : > { %975 = vmatmul.mubr.bf16.gmra.mrb[4].mxu1 %v748_v56  ;;  %2788 = vmatprep.mubr.bf16.mxu0 %v749_v13  ;;  %v701_v20 = vadd.f32 %v3308_v43, %v700_v17  ;;  %v2763_v21 = vpop.f32.mrb[10].mxu0  ;;  %v3055_v56 = vld [vmem:[%s3643_s5 + $0x38] sm:$0xff]   ;;  %v3408_v1 = vrot.slane %v787_v62, %v791_v61  ;;  %v3410_v2 = vrot.slane %v787_v62, %v795_v63 }
 0x10c   : > { %2789 = vmatmul.mubr.bf16.gmra.mrb[20].mxu0 %v750_v12  ;;  %v741_v22 = vmax.f32 %v709_v16, 0.0  ;;  %v712_v23 = vadd.f32 %v2763_v21, %v3308_v43  ;;  %v703_v24 = vpop.f32.mrb[11].mxu0  ;;  %984 = vmatprep.mubr.bf16.mxu1 %v3097_v40  ;;  %v3412_v3 = vrot.slane %v787_v62, %v799_v0 }
 0x10d   : > { %v739_v25 = vmax.f32 %v701_v20, 0.0  ;;  %v704_v26 = vadd.f32 %v3308_v43, %v703_v24  ;;  %2597 = vmatpush3.bf16.msra.mxu0 %v3040_v15  ;;  %2805 = vmatpush3.bf16.msra.mxu1 %v3041_v10 }
 0x10e   : > { %v742_v28 = vmax.f32 %v712_v23, 0.0  ;;  %2598 = vmatprep.subr.bf16.mxu0 %v3042_v18  ;;  %2806 = vmatprep.subr.bf16.mxu1 %v3044_v19 }
 0x10f   : > { %v740_v31 = vmax.f32 %v704_v26, 0.0 }
 0x110   : > { %v752_v32 = vpack.c.bf16 %v742_v28, %v741_v22 }
 0x111   : > { %v751_v33 = vpack.c.bf16 %v740_v31, %v739_v25  ;;  %v2766_v34 = vpop.f32.mrb[12].mxu0  ;;  %2599 = vmatpush3.bf16.msra.mxu0 %v3043_v27  ;;  %2807 = vmatpush3.bf16.msra.mxu1 %v3044_v19 }
 0x112   : > { %v725_v36 = vadd.f32 %v2766_v34, %v3308_v43  ;;  %v716_v37 = vpop.f32.mrb[13].mxu0  ;;  %2600 = vmatprep.subr.bf16.mxu0 %v3045_v29  ;;  %2808 = vmatprep.subr.bf16.mxu1 %v3047_v30 }
 0x113   : > { %985 = vmatmul.mubr.bf16.gmra.mrb[8].mxu1 %v749_v13  ;;  %2792 = vmatprep.mubr.bf16.mxu0 %v751_v33  ;;  %v717_v39 = vadd.f32 %v3308_v43, %v716_v37  ;;  %v2767_v41 = vpop.f32.mrb[14].mxu0 }
 0x114   : > { %2793 = vmatmul.mubr.bf16.gmra.mrb[24].mxu0 %v752_v32  ;;  %994 = vmatprep.mubr.bf16.mxu1 %v3097_v40  ;;  %v745_v42 = vmax.f32 %v725_v36, 0.0  ;;  %v728_v44 = vadd.f32 %v2767_v41, %v3308_v43  ;;  %v719_v45 = vpop.f32.mrb[15].mxu0  ;;  %v3058_v41 = vld [vmem:[%s3645_s7 + $0x8] sm:$0xff]  }
 0x115   : > { %v743_v46 = vmax.f32 %v717_v39, 0.0  ;;  %v720_v47 = vadd.f32 %v3308_v43, %v719_v45  ;;  %2601 = vmatpush3.bf16.msra.mxu0 %v3046_v35  ;;  %2809 = vmatpush3.bf16.msra.mxu1 %v3047_v30  ;;  %v3050_v43 = vld [vmem:[%s3643_s5 + $0xa8] sm:$0xff]  }
 0x116   : > { %v746_v49 = vmax.f32 %v728_v44, 0.0  ;;  %2602 = vmatprep.subr.bf16.mxu0 %v3048_v38  ;;  %2810 = vmatprep.subr.bf16.mxu1 %v3050_v43 }
 0x117   : > { %v744_v50 = vmax.f32 %v720_v47, 0.0 }
 0x118   : > { %v754_v51 = vpack.c.bf16 %v746_v49, %v745_v42 }
 0x119   : > { %v753_v52 = vpack.c.bf16 %v744_v50, %v743_v46  ;;  %2603 = vmatpush3.bf16.msra.mxu0 %v3049_v48  ;;  %2811 = vmatpush3.bf16.msra.mxu1 %v3050_v43 }
 0x11a   : > { %2604 = vmatprep.subr.bf16.mxu0 %v3051_v53  ;;  %2812 = vmatprep.subr.bf16.mxu1 %v3053_v55 }
 0x11b   : > { %995 = vmatmul.mubr.bf16.gmra.mrb[12].mxu1 %v750_v12  ;;  %2796 = vmatprep.mubr.bf16.mxu0 %v753_v52 }
 0x11c   : > { %1004 = vmatprep.mubr.bf16.mxu1 %v3097_v40  ;;  %2797 = vmatmul.mubr.bf16.gmra.mrb[28].mxu0 %v754_v51 }
 0x11d   : > { %2605 = vmatpush3.bf16.msra.mxu0 %v3052_v54  ;;  %2813 = vmatpush3.bf16.msra.mxu1 %v3053_v55 }
 0x11e   : > { %2814 = vmatprep.subr.bf16.mxu1 %v3056_v57 }
 0x121   : > { %2815 = vmatpush3.bf16.msra.mxu1 %v3056_v57 }
 0x122   : > { %2832 = vmatprep.subr.bf16.mxu1 %v3402_v58 }
 0x123   : > { %1005 = vmatmul.mubr.bf16.gmra.mrb[16].mxu1 %v751_v33 }
 0x124   : > { %1014 = vmatprep.mubr.bf16.mxu1 %v3097_v40 }
 0x12b   : > { %1015 = vmatmul.mubr.bf16.gmra.mrb[20].mxu1 %v752_v32 }
 0x12c   : > { %1024 = vmatprep.mubr.bf16.mxu1 %v3097_v40 }
 0x133   : > { %1025 = vmatmul.mubr.bf16.gmra.mrb[24].mxu1 %v753_v52 }
 0x134   : > { %1034 = vmatprep.mubr.bf16.mxu1 %v3097_v40  ;;  %v3054_v40 = vld [vmem:[%s3643_s5 + $0x78] sm:$0xff]  }
 0x135   : > { %2606 = vmatprep.subr.bf16.mxu0 %v3054_v40 }
 0x136   : > { %2607 = vmatpush3.bf16.msra.mxu0 %v3055_v56  ;;  %v3059_v56 = vld [vmem:[%s3645_s7 + $0x10] sm:$0xff]  }
 0x13b   : > { %1035 = vmatmul.mubr.bf16.gmra.mrb[28].mxu1 %v754_v51 }
 0x1d6   : > { %v966_v4 = vpop.f32.mrb[0].mxu1 }
 0x1d7   : > { %v967_v5 = vadd.f32 %v966_v4, %v3408_v1  ;;  %v968_v6 = vpop.f32.mrb[1].mxu1  ;;  %v2786_v7 = vpop.f32.mrb[16].mxu0 }
 0x1d8   : > { %v969_v8 = vadd.f32 %v968_v6, %v3410_v2  ;;  %v1088_v9 = vadd.f32 %v2786_v7, %v3412_v3  ;;  %v970_v10 = vpop.f32.mrb[2].mxu1  ;;  %v1079_v11 = vpop.f32.mrb[17].mxu0 }
 0x1d9   : > { %v971_v12 = vadd.f32 %v970_v10, %v3408_v1  ;;  %v1080_v13 = vadd.f32 %v1079_v11, %v3412_v3  ;;  %v972_v14 = vpop.f32.mrb[3].mxu1  ;;  %v2787_v15 = vpop.f32.mrb[18].mxu0  ;;  %v1142_v19 = vmax.f32 %v967_v5, 0.0 }
 0x1da   : > { %v973_v16 = vadd.f32 %v972_v14, %v3410_v2  ;;  %v1091_v17 = vadd.f32 %v2787_v15, %v3412_v3  ;;  %v1082_v18 = vpop.f32.mrb[19].mxu0  ;;  %v1143_v22 = vmax.f32 %v969_v8, 0.0  ;;  %v1150_v23 = vmax.f32 %v1088_v9, 0.0 }
 0x1db   : > { %v1145_v20 = vmax.f32 %v971_v12, 0.0  ;;  %v1083_v21 = vadd.f32 %v1082_v18, %v3412_v3  ;;  %v1144_v27 = vmax.f32 %v1080_v13, 0.0 }
 0x1dc   : > { %v1146_v24 = vmax.f32 %v973_v16, 0.0  ;;  %v1153_v25 = vmax.f32 %v1091_v17, 0.0 }
 0x1dd   : > { %v1190_v26 = vpack.c.bf16 %v1145_v20, %v1142_v19  ;;  %v1147_v28 = vmax.f32 %v1083_v21, 0.0 }
 0x1de   : > { %v1191_v29 = vpack.c.bf16 %v1146_v24, %v1143_v22  ;;  %v1195_v30 = vpack.c.bf16 %v1153_v25, %v1150_v23  ;;  %v976_v31 = vpop.f32.mrb[4].mxu1 }
 0x1df   : > { %v1192_v32 = vpack.c.bf16 %v1147_v28, %v1144_v27  ;;  %v977_v33 = vadd.f32 %v976_v31, %v3408_v1  ;;  %v978_v34 = vpop.f32.mrb[5].mxu1  ;;  %v2790_v35 = vpop.f32.mrb[20].mxu0 }
 0x1e0   : > { %v979_v36 = vadd.f32 %v978_v34, %v3410_v2  ;;  %v1104_v37 = vadd.f32 %v2790_v35, %v3412_v3  ;;  %v980_v38 = vpop.f32.mrb[6].mxu1  ;;  %v1095_v39 = vpop.f32.mrb[21].mxu0  ;;  %1445 = vmatprep.mubr.bf16.mxu0 %v1191_v29 }
 0x1e1   : > { %v981_v42 = vadd.f32 %v980_v38, %v3408_v1  ;;  %v1096_v44 = vadd.f32 %v1095_v39, %v3412_v3  ;;  %v982_v45 = vpop.f32.mrb[7].mxu1  ;;  %v2791_v46 = vpop.f32.mrb[22].mxu0  ;;  %1446 = vmatmul.mubr.bf16.vlgmr.msra.gmra.mrb[32].mxu0 %v1190_v26  ;;  %2816 = vmatprep.mubr.bf16.mxu1 %v1192_v32  ;;  %v1148_v51 = vmax.f32 %v977_v33, 0.0 }
 0x1e2   : > { %v1162_v47 = vmax.f32 %v1104_v37, 0.0  ;;  %v983_v48 = vadd.f32 %v982_v45, %v3410_v2  ;;  %v1107_v49 = vadd.f32 %v2791_v46, %v3412_v3  ;;  %v1098_v50 = vpop.f32.mrb[23].mxu0  ;;  %2817 = vmatmul.mubr.bf16.vlgmr.msra.gmra.mrb[32].mxu1 %v1195_v30  ;;  %v1149_v54 = vmax.f32 %v979_v36, 0.0 }
 0x1e3   : > { %v1151_v52 = vmax.f32 %v981_v42, 0.0  ;;  %v1156_v43 = vmax.f32 %v1096_v44, 0.0  ;;  %v1099_v53 = vadd.f32 %v1098_v50, %v3412_v3  ;;  %2833 = vmatpush3.bf16.msra.mxu1 %v3402_v58 }
 0x1e4   : > { %v1152_v55 = vmax.f32 %v983_v48, 0.0  ;;  %v1165_v40 = vmax.f32 %v1107_v49, 0.0  ;;  %2834 = vmatprep.subr.bf16.mxu1 %v3058_v41 }
 0x1e5   : > { %v1193_v57 = vpack.c.bf16 %v1151_v52, %v1148_v51  ;;  %v1159_v59 = vmax.f32 %v1099_v53, 0.0 }
 0x1e6   : > { %v1194_v60 = vpack.c.bf16 %v1152_v55, %v1149_v54  ;;  %v1201_v61 = vpack.c.bf16 %v1165_v40, %v1162_v47  ;;  %v986_v62 = vpop.f32.mrb[8].mxu1 }
 0x1e7   : > { %v1198_v63 = vpack.c.bf16 %v1159_v59, %v1156_v43  ;;  %v987_v0 = vadd.f32 %v986_v62, %v3408_v1  ;;  %v988_v4 = vpop.f32.mrb[9].mxu1  ;;  %v2794_v5 = vpop.f32.mrb[24].mxu0  ;;  %2835 = vmatpush3.bf16.msra.mxu1 %v3058_v41 }
 0x1e8   : > { %v989_v58 = vadd.f32 %v988_v4, %v3410_v2  ;;  %v990_v6 = vpop.f32.mrb[10].mxu1  ;;  %1453 = vmatprep.mubr.bf16.mxu0 %v1194_v60  ;;  %v1120_v7 = vadd.f32 %v2794_v5, %v3412_v3  ;;  %v1111_v8 = vpop.f32.mrb[25].mxu0  ;;  %2836 = vmatprep.subr.bf16.mxu1 %v3059_v56 }
 0x1e9   : > { %v991_v9 = vadd.f32 %v990_v6, %v3408_v1  ;;  %v992_v10 = vpop.f32.mrb[11].mxu1  ;;  %1454 = vmatmul.mubr.bf16.gmra.mrb[36].mxu0 %v1193_v57  ;;  %2820 = vmatprep.mubr.bf16.mxu1 %v1198_v63  ;;  %v1112_v11 = vadd.f32 %v1111_v8, %v3412_v3  ;;  %v2795_v12 = vpop.f32.mrb[26].mxu0  ;;  %v1154_v17 = vmax.f32 %v987_v0, 0.0 }
 0x1ea   : > { %v993_v13 = vadd.f32 %v992_v10, %v3410_v2  ;;  %2821 = vmatmul.mubr.bf16.gmra.mrb[36].mxu1 %v1201_v61  ;;  %v1174_v14 = vmax.f32 %v1120_v7, 0.0  ;;  %v1123_v15 = vadd.f32 %v2795_v12, %v3412_v3  ;;  %v1114_v16 = vpop.f32.mrb[27].mxu0  ;;  %v1155_v21 = vmax.f32 %v989_v58, 0.0 }
 0x1eb   : > { %v1157_v18 = vmax.f32 %v991_v9, 0.0  ;;  %v1168_v19 = vmax.f32 %v1112_v11, 0.0  ;;  %v1115_v20 = vadd.f32 %v1114_v16, %v3412_v3  ;;  %2837 = vmatpush3.bf16.msra.mxu1 %v3059_v56 }
 0x1ec   : > { %v1158_v22 = vmax.f32 %v993_v13, 0.0  ;;  %v1177_v23 = vmax.f32 %v1123_v15, 0.0 }
 0x1ed   : > { %v1196_v24 = vpack.c.bf16 %v1157_v18, %v1154_v17  ;;  %v1171_v25 = vmax.f32 %v1115_v20, 0.0 }
 0x1ee   : > { %v1197_v26 = vpack.c.bf16 %v1158_v22, %v1155_v21  ;;  %v996_v27 = vpop.f32.mrb[12].mxu1  ;;  %v1207_v28 = vpack.c.bf16 %v1177_v23, %v1174_v14 }
 0x1ef   : > { %v997_v29 = vadd.f32 %v996_v27, %v3408_v1  ;;  %v998_v30 = vpop.f32.mrb[13].mxu1  ;;  %v1204_v31 = vpack.c.bf16 %v1171_v25, %v1168_v19  ;;  %v2798_v32 = vpop.f32.mrb[28].mxu0 }
 0x1f0   : > { %v999_v33 = vadd.f32 %v998_v30, %v3410_v2  ;;  %v1000_v34 = vpop.f32.mrb[14].mxu1  ;;  %1461 = vmatprep.mubr.bf16.mxu0 %v1197_v26  ;;  %v1136_v35 = vadd.f32 %v2798_v32, %v3412_v3  ;;  %v1127_v36 = vpop.f32.mrb[29].mxu0 }
 0x1f1   : > { %v1001_v37 = vadd.f32 %v1000_v34, %v3408_v1  ;;  %v1002_v38 = vpop.f32.mrb[15].mxu1  ;;  %1462 = vmatmul.mubr.bf16.gmra.mrb[40].mxu0 %v1196_v24  ;;  %2824 = vmatprep.mubr.bf16.mxu1 %v1204_v31  ;;  %v1128_v39 = vadd.f32 %v1127_v36, %v3412_v3  ;;  %v2799_v41 = vpop.f32.mrb[30].mxu0  ;;  %v1160_v47 = vmax.f32 %v997_v29, 0.0 }
 0x1f2   : > { %v1003_v42 = vadd.f32 %v1002_v38, %v3410_v2  ;;  %2825 = vmatmul.mubr.bf16.gmra.mrb[40].mxu1 %v1207_v28  ;;  %v1186_v44 = vmax.f32 %v1136_v35, 0.0  ;;  %v1139_v45 = vadd.f32 %v2799_v41, %v3412_v3  ;;  %v1130_v46 = vpop.f32.mrb[31].mxu0  ;;  %v1161_v51 = vmax.f32 %v999_v33, 0.0 }
 0x1f3   : > { %v1163_v48 = vmax.f32 %v1001_v37, 0.0  ;;  %v1180_v49 = vmax.f32 %v1128_v39, 0.0  ;;  %v1131_v50 = vadd.f32 %v1130_v46, %v3412_v3 }
 0x1f4   : > { %v1164_v52 = vmax.f32 %v1003_v42, 0.0  ;;  %v1189_v43 = vmax.f32 %v1139_v45, 0.0 }
 0x1f5   : > { %v1199_v53 = vpack.c.bf16 %v1163_v48, %v1160_v47  ;;  %v1183_v54 = vmax.f32 %v1131_v50, 0.0 }
 0x1f6   : > { %v1200_v55 = vpack.c.bf16 %v1164_v52, %v1161_v51  ;;  %v1006_v40 = vpop.f32.mrb[16].mxu1  ;;  %v1213_v56 = vpack.c.bf16 %v1189_v43, %v1186_v44  ;;  %v3060_v43 = vld [vmem:[%s3645_s7 + $0x18] sm:$0xff]  }
 0x1f7   : > { %v1007_v57 = vadd.f32 %v1006_v40, %v3408_v1  ;;  %v1008_v59 = vpop.f32.mrb[17].mxu1  ;;  %v1210_v60 = vpack.c.bf16 %v1183_v54, %v1180_v49  ;;  %2838 = vmatprep.subr.bf16.mxu1 %v3060_v43  ;;  %v3064_v54 = vld [vmem:[%s3645_s7 + $0x38] sm:$0xff]   ;;  %v3066_v40 = vld [vmem:[%s3647_s9 + $0x8] sm:$0xff]  }
 0x1f8   : > { %v1009_v61 = vadd.f32 %v1008_v59, %v3410_v2  ;;  %v1010_v62 = vpop.f32.mrb[18].mxu1  ;;  %1469 = vmatprep.mubr.bf16.mxu0 %v1200_v55  ;;  %2839 = vmatpush3.bf16.msra.mxu1 %v3060_v43  ;;  %v3065_v55 = vld [vmem:[%s3647_s9] sm:$0xff]  }
 0x1f9   : > { %v1011_v63 = vadd.f32 %v1010_v62, %v3408_v1  ;;  %v1012_v0 = vpop.f32.mrb[19].mxu1  ;;  %1470 = vmatmul.mubr.bf16.gmra.mrb[44].mxu0 %v1199_v53  ;;  %2828 = vmatprep.mubr.bf16.mxu1 %v1210_v60  ;;  %v1166_v4 = vmax.f32 %v1007_v57, 0.0  ;;  %v3063_v53 = vld [vmem:[%s3645_s7 + $0x30] sm:$0xff]   ;;  %v3068_v57 = vld [vmem:[%s3647_s9 + $0x18] sm:$0xff]   ;;  %v3069_v59 = vld [vmem:[%s3647_s9 + $0x20] sm:$0xff]  }
 0x1fa   : > { %v1013_v3 = vadd.f32 %v1012_v0, %v3410_v2  ;;  %2829 = vmatmul.mubr.bf16.gmra.mrb[44].mxu1 %v1213_v56  ;;  %v1167_v58 = vmax.f32 %v1009_v61, 0.0  ;;  %2864 = vmatprep.subr.bf16.mxu0 %v3065_v55  ;;  %v3067_v56 = vld [vmem:[%s3647_s9 + $0x10] sm:$0xff]   ;;  %v3070_v60 = vld [vmem:[%s3647_s9 + $0x28] sm:$0xff]   ;;  %v3505_v0 = vld [vmem:[%s3644_s6] ss:$0 sm:$0xff] }
 0x1fb   : > { %v1169_v5 = vmax.f32 %v1011_v63, 0.0  ;;  %2865 = vmatpush3.bf16.msra.mxu0 %v3065_v55 }
 0x1fc   : > { %v1170_v6 = vmax.f32 %v1013_v3, 0.0  ;;  %2866 = vmatprep.subr.bf16.mxu0 %v3066_v40 }
 0x1fd   : > { %v1202_v7 = vpack.c.bf16 %v1169_v5, %v1166_v4 }
 0x1fe   : > { %v1203_v8 = vpack.c.bf16 %v1170_v6, %v1167_v58  ;;  %v1016_v9 = vpop.f32.mrb[20].mxu1 }
 0x1ff   : > { %v1017_v10 = vadd.f32 %v1016_v9, %v3408_v1  ;;  %v1018_v11 = vpop.f32.mrb[21].mxu1  ;;  %2867 = vmatpush3.bf16.msra.mxu0 %v3066_v40 }
 0x200   : > { %v1019_v12 = vadd.f32 %v1018_v11, %v3410_v2  ;;  %v1020_v13 = vpop.f32.mrb[22].mxu1  ;;  %1477 = vmatprep.mubr.bf16.mxu0 %v1203_v8  ;;  %2868 = vmatprep.subr.bf16.mxu0 %v3067_v56 }
 0x201   : > { %v1021_v14 = vadd.f32 %v1020_v13, %v3408_v1  ;;  %v1022_v15 = vpop.f32.mrb[23].mxu1  ;;  %1478 = vmatmul.mubr.bf16.gmra.mrb[48].mxu0 %v1202_v7  ;;  %v1172_v17 = vmax.f32 %v1017_v10, 0.0 }
 0x202   : > { %v1023_v16 = vadd.f32 %v1022_v15, %v3410_v2  ;;  %v1173_v19 = vmax.f32 %v1019_v12, 0.0 }
 0x203   : > { %v1175_v18 = vmax.f32 %v1021_v14, 0.0  ;;  %2869 = vmatpush3.bf16.msra.mxu0 %v3067_v56 }
 0x204   : > { %v1176_v20 = vmax.f32 %v1023_v16, 0.0  ;;  %2870 = vmatprep.subr.bf16.mxu0 %v3068_v57 }
 0x205   : > { %v1205_v21 = vpack.c.bf16 %v1175_v18, %v1172_v17 }
 0x206   : > { %v1206_v22 = vpack.c.bf16 %v1176_v20, %v1173_v19  ;;  %v1026_v23 = vpop.f32.mrb[24].mxu1 }
 0x207   : > { %v1027_v24 = vadd.f32 %v1026_v23, %v3408_v1  ;;  %v1028_v25 = vpop.f32.mrb[25].mxu1  ;;  %2871 = vmatpush3.bf16.msra.mxu0 %v3068_v57 }
 0x208   : > { %v1029_v26 = vadd.f32 %v1028_v25, %v3410_v2  ;;  %v1030_v27 = vpop.f32.mrb[26].mxu1  ;;  %1485 = vmatprep.mubr.bf16.mxu0 %v1206_v22  ;;  %2872 = vmatprep.subr.bf16.mxu0 %v3069_v59 }
 0x209   : > { %v1031_v28 = vadd.f32 %v1030_v27, %v3408_v1  ;;  %v1032_v29 = vpop.f32.mrb[27].mxu1  ;;  %1486 = vmatmul.mubr.bf16.gmra.mrb[52].mxu0 %v1205_v21  ;;  %v1178_v31 = vmax.f32 %v1027_v24, 0.0 }
 0x20a   : > { %v1033_v30 = vadd.f32 %v1032_v29, %v3410_v2  ;;  %v1179_v33 = vmax.f32 %v1029_v26, 0.0 }
 0x20b   : > { %v1181_v32 = vmax.f32 %v1031_v28, 0.0  ;;  %2873 = vmatpush3.bf16.msra.mxu0 %v3069_v59 }
 0x20c   : > { %v1182_v34 = vmax.f32 %v1033_v30, 0.0  ;;  %2874 = vmatprep.subr.bf16.mxu0 %v3070_v60 }
 0x20d   : > { %v1208_v35 = vpack.c.bf16 %v1181_v32, %v1178_v31 }
 0x20e   : > { %v1209_v36 = vpack.c.bf16 %v1182_v34, %v1179_v33  ;;  %v1036_v37 = vpop.f32.mrb[28].mxu1 }
 0x20f   : > { %v1037_v38 = vadd.f32 %v1036_v37, %v3408_v1  ;;  %v1038_v39 = vpop.f32.mrb[29].mxu1  ;;  %2875 = vmatpush3.bf16.msra.mxu0 %v3070_v60 }
 0x210   : > { %v1039_v41 = vadd.f32 %v1038_v39, %v3410_v2  ;;  %v1040_v42 = vpop.f32.mrb[30].mxu1  ;;  %1493 = vmatprep.mubr.bf16.mxu0 %v1209_v36 }
 0x211   : > { %v1041_v44 = vadd.f32 %v1040_v42, %v3408_v1  ;;  %v1042_v45 = vpop.f32.mrb[31].mxu1  ;;  %1494 = vmatmul.mubr.bf16.gmra.mrb[56].mxu0 %v1208_v35  ;;  %v1184_v47 = vmax.f32 %v1037_v38, 0.0  ;;  %v3061_v1 = vld [vmem:[%s3645_s7 + $0x20] sm:$0xff]  }
 0x212   : > { %v1043_v46 = vadd.f32 %v1042_v45, %v3410_v2  ;;  %v1185_v49 = vmax.f32 %v1039_v41, 0.0  ;;  %2840 = vmatprep.subr.bf16.mxu1 %v3061_v1  ;;  %v3062_v2 = vld [vmem:[%s3645_s7 + $0x28] sm:$0xff]  }
 0x213   : > { %v1187_v48 = vmax.f32 %v1041_v44, 0.0  ;;  %2841 = vmatpush3.bf16.msra.mxu1 %v3061_v1 }
 0x214   : > { %v1188_v50 = vmax.f32 %v1043_v46, 0.0  ;;  %2842 = vmatprep.subr.bf16.mxu1 %v3062_v2 }
 0x215   : > { %v1211_v51 = vpack.c.bf16 %v1187_v48, %v1184_v47 }
 0x216   : > { %v1212_v52 = vpack.c.bf16 %v1188_v50, %v1185_v49 }
 0x217   : > { %2843 = vmatpush3.bf16.msra.mxu1 %v3062_v2 }
 0x218   : > { %1501 = vmatprep.mubr.bf16.mxu0 %v1212_v52  ;;  %2844 = vmatprep.subr.bf16.mxu1 %v3063_v53 }
 0x219   : > { %1502 = vmatmul.mubr.bf16.gmra.mrb[60].mxu0 %v1211_v51 }
 0x21b   : > { %2845 = vmatpush3.bf16.msra.mxu1 %v3063_v53 }
 0x21c   : > { %2846 = vmatprep.subr.bf16.mxu1 %v3064_v54 }
 0x21f   : > { %2847 = vmatpush3.bf16.msra.mxu1 %v3064_v54 }
 0x2b4   : > { %v2608_v61 = vpop.f32.mrb[32].mxu0 }
 0x2b5   : > { %v2609_v62 = vpop.f32.mrb[33].mxu0  ;;  %v2818_v63 = vpop.f32.mrb[32].mxu1 }
 0x2b6   : > { %v2610_v3 = vadd.f32 %v2609_v62, %v2608_v61  ;;  %v2611_v4 = vpop.f32.mrb[34].mxu0  ;;  %v1544_v5 = vpop.f32.mrb[33].mxu1 }
 0x2b7   : > { %v2612_v58 = vpop.f32.mrb[35].mxu0  ;;  %v2819_v6 = vpop.f32.mrb[34].mxu1 }
 0x2b8   : > { %v1448_v7 = vadd.f32 %v2610_v3, %v3505_v0  ;;  %v2613_v8 = vadd.f32 %v2612_v58, %v2611_v4  ;;  %v1547_v9 = vpop.f32.mrb[35].mxu1 }
 0x2ba   : > { %v1545_v10 = vadd.f32 %v1544_v5, %v1448_v7  ;;  %v1451_v11 = vadd.f32 %v2613_v8, %v3505_v0 }
 0x2bc   : > { %v1548_v12 = vadd.f32 %v1547_v9, %v1451_v11  ;;  %v2614_v13 = vpop.f32.mrb[36].mxu0  ;;  %v1607_v16 = vmax.f32 %v1545_v10, 0.0 }
 0x2bd   : > { %v2615_v14 = vpop.f32.mrb[37].mxu0  ;;  %v2822_v15 = vpop.f32.mrb[36].mxu1 }
 0x2be   : > { %v1608_v17 = vmax.f32 %v1548_v12, 0.0  ;;  %v2616_v18 = vadd.f32 %v2615_v14, %v2614_v13  ;;  %v2617_v19 = vpop.f32.mrb[38].mxu0  ;;  %v1560_v20 = vpop.f32.mrb[37].mxu1 }
 0x2bf   : > { %v2618_v21 = vpop.f32.mrb[39].mxu0  ;;  %v2823_v22 = vpop.f32.mrb[38].mxu1 }
 0x2c0   : > { %v1623_v23 = vpack.c.bf16 %v1608_v17, %v1607_v16  ;;  %v1456_v24 = vadd.f32 %v2616_v18, %v3505_v0  ;;  %v2619_v25 = vadd.f32 %v2618_v21, %v2617_v19  ;;  %v1563_v26 = vpop.f32.mrb[39].mxu1 }
 0x2c2   : > { %v1553_v27 = vadd.f32 %v2818_v63, %v1456_v24  ;;  %v1459_v28 = vadd.f32 %v2619_v25, %v3505_v0  ;;  %2848 = vmatprep.mubr.bf16.mxu1 %v1623_v23 }
 0x2c4   : > { %v1556_v29 = vadd.f32 %v2819_v6, %v1459_v28  ;;  %v2620_v30 = vpop.f32.mrb[40].mxu0  ;;  %v1609_v33 = vmax.f32 %v1553_v27, 0.0 }
 0x2c5   : > { %v2621_v31 = vpop.f32.mrb[41].mxu0  ;;  %v2826_v32 = vpop.f32.mrb[40].mxu1 }
 0x2c6   : > { %v1610_v34 = vmax.f32 %v1556_v29, 0.0  ;;  %v2622_v35 = vadd.f32 %v2621_v31, %v2620_v30  ;;  %v2623_v36 = vpop.f32.mrb[42].mxu0  ;;  %v1576_v37 = vpop.f32.mrb[41].mxu1 }
 0x2c7   : > { %v2624_v38 = vpop.f32.mrb[43].mxu0  ;;  %v2827_v39 = vpop.f32.mrb[42].mxu1 }
 0x2c8   : > { %v1624_v41 = vpack.c.bf16 %v1610_v34, %v1609_v33  ;;  %v1464_v42 = vadd.f32 %v2622_v35, %v3505_v0  ;;  %v2625_v44 = vadd.f32 %v2624_v38, %v2623_v36  ;;  %v1579_v45 = vpop.f32.mrb[43].mxu1 }
 0x2ca   : > { %v1561_v46 = vadd.f32 %v1560_v20, %v1464_v42  ;;  %v1467_v47 = vadd.f32 %v2625_v44, %v3505_v0  ;;  %2849 = vmatmul.mubr.bf16.vlgmr.msra.gmra.mrb[48].mxu1 %v1624_v41 }
 0x2cc   : > { %v1564_v48 = vadd.f32 %v1563_v26, %v1467_v47  ;;  %v2626_v49 = vpop.f32.mrb[44].mxu0  ;;  %v1611_v52 = vmax.f32 %v1561_v46, 0.0 }
 0x2cd   : > { %v2627_v50 = vpop.f32.mrb[45].mxu0  ;;  %v3513_v51 = vpop.f32.mrb[44].mxu1 }
 0x2ce   : > { %v1612_v43 = vmax.f32 %v1564_v48, 0.0  ;;  %v2628_v1 = vadd.f32 %v2627_v50, %v2626_v49  ;;  %v2629_v2 = vpop.f32.mrb[46].mxu0  ;;  %v1592_v53 = vpop.f32.mrb[45].mxu1 }
 0x2cf   : > { %v2630_v54 = vpop.f32.mrb[47].mxu0  ;;  %v3515_v55 = vpop.f32.mrb[46].mxu1 }
 0x2d0   : > { %v1472_v40 = vadd.f32 %v2628_v1, %v3505_v0  ;;  %v2631_v56 = vadd.f32 %v2630_v54, %v2629_v2  ;;  %v1625_v57 = vpack.c.bf16 %v1612_v43, %v1611_v52  ;;  %v1595_v59 = vpop.f32.mrb[47].mxu1 }
 0x2d2   : > { %v1569_v60 = vadd.f32 %v2822_v15, %v1472_v40  ;;  %v1475_v61 = vadd.f32 %v2631_v56, %v3505_v0  ;;  %2852 = vmatprep.mubr.bf16.mxu1 %v1625_v57  ;;  %v3071_v56 = vld [vmem:[%s3647_s9 + $0x30] sm:$0xff]   ;;  %v3072_v57 = vld [vmem:[%s3647_s9 + $0x38] sm:$0xff]  }
 0x2d3   : > { %2876 = vmatprep.subr.bf16.mxu0 %v3071_v56 }
 0x2d4   : > { %v1572_v62 = vadd.f32 %v2823_v22, %v1475_v61  ;;  %v2632_v63 = vpop.f32.mrb[48].mxu0  ;;  %v1613_v4 = vmax.f32 %v1569_v60, 0.0  ;;  %2877 = vmatpush3.bf16.msra.mxu0 %v3071_v56  ;;  %v3077_v60 = vld [vmem:[%s3649_s11 + $0x20] sm:$0xff]   ;;  %v3078_v61 = vld [vmem:[%s3649_s11 + $0x28] sm:$0xff]  }
 0x2d5   : > { %v2633_v3 = vpop.f32.mrb[49].mxu0  ;;  %2878 = vmatprep.subr.bf16.mxu0 %v3072_v57 }
 0x2d6   : > { %v1614_v5 = vmax.f32 %v1572_v62, 0.0  ;;  %v2634_v58 = vadd.f32 %v2633_v3, %v2632_v63  ;;  %v2635_v6 = vpop.f32.mrb[50].mxu0  ;;  %v2522_v62 = vld [vmem:[%s3646_s8] ss:$0 sm:$0xff] }
 0x2d7   : > { %v2636_v7 = vpop.f32.mrb[51].mxu0 }
 0x2d8   : > { %v1480_v8 = vadd.f32 %v2634_v58, %v3505_v0  ;;  %v2637_v9 = vadd.f32 %v2636_v7, %v2635_v6  ;;  %v1626_v10 = vpack.c.bf16 %v1614_v5, %v1613_v4  ;;  %2879 = vmatpush3.bf16.msra.mxu0 %v3072_v57  ;;  %v3079_v57 = vld [vmem:[%s3649_s11 + $0x30] sm:$0xff]  }
 0x2da   : > { %v1577_v11 = vadd.f32 %v1576_v37, %v1480_v8  ;;  %v1483_v12 = vadd.f32 %v2637_v9, %v3505_v0  ;;  %2853 = vmatmul.mubr.bf16.gmra.mrb[52].mxu1 %v1626_v10 }
 0x2dc   : > { %v1580_v13 = vadd.f32 %v1579_v45, %v1483_v12  ;;  %v2638_v14 = vpop.f32.mrb[52].mxu0  ;;  %v1615_v16 = vmax.f32 %v1577_v11, 0.0 }
 0x2dd   : > { %v2639_v15 = vpop.f32.mrb[53].mxu0 }
 0x2de   : > { %v1616_v17 = vmax.f32 %v1580_v13, 0.0  ;;  %v2640_v18 = vadd.f32 %v2639_v15, %v2638_v14  ;;  %v2641_v19 = vpop.f32.mrb[54].mxu0 }
 0x2df   : > { %v2642_v20 = vpop.f32.mrb[55].mxu0 }
 0x2e0   : > { %v1488_v21 = vadd.f32 %v2640_v18, %v3505_v0  ;;  %v2643_v22 = vadd.f32 %v2642_v20, %v2641_v19  ;;  %v1627_v23 = vpack.c.bf16 %v1616_v17, %v1615_v16 }
 0x2e2   : > { %v1585_v24 = vadd.f32 %v2826_v32, %v1488_v21  ;;  %v1491_v25 = vadd.f32 %v2643_v22, %v3505_v0  ;;  %2856 = vmatprep.mubr.bf16.mxu1 %v1627_v23 }
 0x2e4   : > { %v1588_v26 = vadd.f32 %v2827_v39, %v1491_v25  ;;  %v2644_v27 = vpop.f32.mrb[56].mxu0  ;;  %v1617_v29 = vmax.f32 %v1585_v24, 0.0 }
 0x2e5   : > { %v2645_v28 = vpop.f32.mrb[57].mxu0 }
 0x2e6   : > { %v1618_v30 = vmax.f32 %v1588_v26, 0.0  ;;  %v2646_v31 = vadd.f32 %v2645_v28, %v2644_v27  ;;  %v2647_v33 = vpop.f32.mrb[58].mxu0 }
 0x2e7   : > { %v2648_v34 = vpop.f32.mrb[59].mxu0 }
 0x2e8   : > { %v1496_v35 = vadd.f32 %v2646_v31, %v3505_v0  ;;  %v2649_v36 = vadd.f32 %v2648_v34, %v2647_v33  ;;  %v1628_v37 = vpack.c.bf16 %v1618_v30, %v1617_v29 }
 0x2ea   : > { %v1593_v38 = vadd.f32 %v1592_v53, %v1496_v35  ;;  %v1499_v41 = vadd.f32 %v2649_v36, %v3505_v0  ;;  %2857 = vmatmul.mubr.bf16.gmra.mrb[56].mxu1 %v1628_v37 }
 0x2ec   : > { %v1596_v32 = vadd.f32 %v1595_v59, %v1499_v41  ;;  %v2650_v42 = vpop.f32.mrb[60].mxu0  ;;  %v1619_v45 = vmax.f32 %v1593_v38, 0.0  ;;  %v3076_v59 = vld [vmem:[%s3649_s11 + $0x18] sm:$0xff]  }
 0x2ed   : > { %v2651_v44 = vpop.f32.mrb[61].mxu0 }
 0x2ee   : > { %v1620_v39 = vmax.f32 %v1596_v32, 0.0  ;;  %v2652_v46 = vadd.f32 %v2651_v44, %v2650_v42  ;;  %v2653_v47 = vpop.f32.mrb[62].mxu0 }
 0x2ef   : > { %v2654_v48 = vpop.f32.mrb[63].mxu0 }
 0x2f0   : > { %v1504_v49 = vadd.f32 %v2652_v46, %v3505_v0  ;;  %v2655_v50 = vadd.f32 %v2654_v48, %v2653_v47  ;;  %v1629_v52 = vpack.c.bf16 %v1620_v39, %v1619_v45 }
 0x2f2   : > { %v1601_v43 = vadd.f32 %v3513_v51, %v1504_v49  ;;  %v1507_v1 = vadd.f32 %v2655_v50, %v3505_v0  ;;  %2860 = vmatprep.mubr.bf16.mxu1 %v1629_v52  ;;  %v3073_v0 = vld [vmem:[%s3649_s11] sm:$0xff]   ;;  %v3074_v51 = vld [vmem:[%s3649_s11 + $0x8] sm:$0xff]  }
 0x2f3   : > { %2896 = vmatprep.subr.bf16.mxu1 %v3073_v0 }
 0x2f4   : > { %v1604_v2 = vadd.f32 %v3515_v55, %v1507_v1  ;;  %v1621_v53 = vmax.f32 %v1601_v43, 0.0  ;;  %2897 = vmatpush3.bf16.msra.mxu1 %v3073_v0  ;;  %v3075_v55 = vld [vmem:[%s3649_s11 + $0x10] sm:$0xff]   ;;  %v3080_v0 = vld [vmem:[%s3649_s11 + $0x38] sm:$0xff]  }
 0x2f5   : > { %2898 = vmatprep.subr.bf16.mxu1 %v3074_v51 }
 0x2f6   : > { %v1622_v54 = vmax.f32 %v1604_v2, 0.0 }
 0x2f8   : > { %v1630_v40 = vpack.c.bf16 %v1622_v54, %v1621_v53  ;;  %2899 = vmatpush3.bf16.msra.mxu1 %v3074_v51  ;;  %v3081_v51 = vld [vmem:[%s3651_s13] sm:$0xff]  }
 0x2f9   : > { %2900 = vmatprep.subr.bf16.mxu1 %v3075_v55  ;;  %2928 = vmatprep.subr.bf16.mxu0 %v3081_v51 }
 0x2fa   : > { %2861 = vmatmul.mubr.bf16.gmra.mrb[60].mxu1 %v1630_v40 }
 0x2fc   : > { %2901 = vmatpush3.bf16.msra.mxu1 %v3075_v55  ;;  %v3082_v55 = vld [vmem:[%s3651_s13 + $0x8] sm:$0xff]  }
 0x2fd   : > { %2902 = vmatprep.subr.bf16.mxu1 %v3076_v59 }
 0x300   : > { %2903 = vmatpush3.bf16.msra.mxu1 %v3076_v59  ;;  %v3083_v59 = vld [vmem:[%s3651_s13 + $0x10] sm:$0xff]  }
 0x301   : > { %2904 = vmatprep.subr.bf16.mxu1 %v3077_v60 }
 0x304   : > { %2905 = vmatpush3.bf16.msra.mxu1 %v3077_v60  ;;  %v3084_v60 = vld [vmem:[%s3651_s13 + $0x18] sm:$0xff]  }
 0x305   : > { %2906 = vmatprep.subr.bf16.mxu1 %v3078_v61 }
 0x308   : > { %2907 = vmatpush3.bf16.msra.mxu1 %v3078_v61  ;;  %v3085_v61 = vld [vmem:[%s3651_s13 + $0x20] sm:$0xff]  }
 0x309   : > { %2908 = vmatprep.subr.bf16.mxu1 %v3079_v57 }
 0x30c   : > { %2909 = vmatpush3.bf16.msra.mxu1 %v3079_v57 }
 0x30d   : > { %2910 = vmatprep.subr.bf16.mxu1 %v3080_v0 }
 0x310   : > { %2911 = vmatpush3.bf16.msra.mxu1 %v3080_v0  ;;  %v3087_v0 = vld [vmem:[%s3651_s13 + $0x30] sm:$0xff]  }
 0x311   : > { %2960 = vmatprep.subr.bf16.mxu1 %v3081_v51 }
 0x39d   : > { %v2850_v63 = vpop.f32.mrb[48].mxu1 }
 0x39e   : > { %v1745_v3 = vadd.f32 %v2850_v63, %v2522_v62  ;;  %v1736_v4 = vpop.f32.mrb[49].mxu1  ;;  %v3583_v63 = vld [vmem:[%s3648_s10] ss:$0 sm:$0xff] }
 0x39f   : > { %v1737_v5 = vadd.f32 %v2522_v62, %v1736_v4  ;;  %v2851_v58 = vpop.f32.mrb[50].mxu1 }
 0x3a0   : > { %v1748_v6 = vadd.f32 %v2851_v58, %v2522_v62  ;;  %v1739_v7 = vpop.f32.mrb[51].mxu1  ;;  %v1801_v9 = vmax.f32 %v1745_v3, 0.0 }
 0x3a1   : > { %v1740_v8 = vadd.f32 %v2522_v62, %v1739_v7  ;;  %v1799_v11 = vmax.f32 %v1737_v5, 0.0 }
 0x3a2   : > { %v1802_v10 = vmax.f32 %v1748_v6, 0.0 }
 0x3a3   : > { %v1800_v12 = vmax.f32 %v1740_v8, 0.0 }
 0x3a4   : > { %v1816_v13 = vpack.c.bf16 %v1802_v10, %v1801_v9 }
 0x3a5   : > { %v1815_v14 = vpack.c.bf16 %v1800_v12, %v1799_v11 }
 0x3a7   : > { %2880 = vmatprep.mubr.bf16.mxu0 %v1815_v14 }
 0x3a8   : > { %2881 = vmatmul.mubr.bf16.vlgmr.msra.gmra.mrb[64].mxu0 %v1816_v13 }
 0x3a9   : > { %2929 = vmatpush3.bf16.msra.mxu0 %v3081_v51 }
 0x3aa   : > { %2930 = vmatprep.subr.bf16.mxu0 %v3082_v55 }
 0x3ad   : > { %v2854_v15 = vpop.f32.mrb[52].mxu1  ;;  %2931 = vmatpush3.bf16.msra.mxu0 %v3082_v55 }
 0x3ae   : > { %v1761_v16 = vadd.f32 %v2854_v15, %v2522_v62  ;;  %v1752_v17 = vpop.f32.mrb[53].mxu1  ;;  %2932 = vmatprep.subr.bf16.mxu0 %v3083_v59 }
 0x3af   : > { %v1753_v18 = vadd.f32 %v2522_v62, %v1752_v17  ;;  %v2855_v19 = vpop.f32.mrb[54].mxu1 }
 0x3b0   : > { %v1764_v20 = vadd.f32 %v2855_v19, %v2522_v62  ;;  %v1755_v21 = vpop.f32.mrb[55].mxu1  ;;  %v1805_v23 = vmax.f32 %v1761_v16, 0.0 }
 0x3b1   : > { %v1756_v22 = vadd.f32 %v2522_v62, %v1755_v21  ;;  %v1803_v25 = vmax.f32 %v1753_v18, 0.0  ;;  %2933 = vmatpush3.bf16.msra.mxu0 %v3083_v59 }
 0x3b2   : > { %v1806_v24 = vmax.f32 %v1764_v20, 0.0  ;;  %2934 = vmatprep.subr.bf16.mxu0 %v3084_v60 }
 0x3b3   : > { %v1804_v26 = vmax.f32 %v1756_v22, 0.0 }
 0x3b4   : > { %v1818_v27 = vpack.c.bf16 %v1806_v24, %v1805_v23 }
 0x3b5   : > { %v1817_v28 = vpack.c.bf16 %v1804_v26, %v1803_v25  ;;  %2935 = vmatpush3.bf16.msra.mxu0 %v3084_v60 }
 0x3b6   : > { %2936 = vmatprep.subr.bf16.mxu0 %v3085_v61 }
 0x3b7   : > { %2884 = vmatprep.mubr.bf16.mxu0 %v1817_v28 }
 0x3b8   : > { %2885 = vmatmul.mubr.bf16.gmra.mrb[68].mxu0 %v1818_v27 }
 0x3b9   : > { %2937 = vmatpush3.bf16.msra.mxu0 %v3085_v61 }
 0x3bd   : > { %v2858_v29 = vpop.f32.mrb[56].mxu1 }
 0x3be   : > { %v1777_v30 = vadd.f32 %v2858_v29, %v2522_v62  ;;  %v1768_v31 = vpop.f32.mrb[57].mxu1 }
 0x3bf   : > { %v1769_v33 = vadd.f32 %v2522_v62, %v1768_v31  ;;  %v2859_v34 = vpop.f32.mrb[58].mxu1 }
 0x3c0   : > { %v1780_v35 = vadd.f32 %v2859_v34, %v2522_v62  ;;  %v1771_v36 = vpop.f32.mrb[59].mxu1  ;;  %v1809_v38 = vmax.f32 %v1777_v30, 0.0 }
 0x3c1   : > { %v1772_v37 = vadd.f32 %v2522_v62, %v1771_v36  ;;  %v1807_v32 = vmax.f32 %v1769_v33, 0.0 }
 0x3c2   : > { %v1810_v41 = vmax.f32 %v1780_v35, 0.0 }
 0x3c3   : > { %v1808_v42 = vmax.f32 %v1772_v37, 0.0 }
 0x3c4   : > { %v1820_v44 = vpack.c.bf16 %v1810_v41, %v1809_v38 }
 0x3c5   : > { %v1819_v45 = vpack.c.bf16 %v1808_v42, %v1807_v32 }
 0x3c7   : > { %2888 = vmatprep.mubr.bf16.mxu0 %v1819_v45 }
 0x3c8   : > { %2889 = vmatmul.mubr.bf16.gmra.mrb[72].mxu0 %v1820_v44 }
 0x3cd   : > { %v2862_v39 = vpop.f32.mrb[60].mxu1 }
 0x3ce   : > { %v1793_v46 = vadd.f32 %v2862_v39, %v2522_v62  ;;  %v1784_v47 = vpop.f32.mrb[61].mxu1 }
 0x3cf   : > { %v1785_v48 = vadd.f32 %v2522_v62, %v1784_v47  ;;  %v2863_v49 = vpop.f32.mrb[62].mxu1 }
 0x3d0   : > { %v1796_v50 = vadd.f32 %v2863_v49, %v2522_v62  ;;  %v1787_v52 = vpop.f32.mrb[63].mxu1  ;;  %v1813_v1 = vmax.f32 %v1793_v46, 0.0 }
 0x3d1   : > { %v1788_v43 = vadd.f32 %v2522_v62, %v1787_v52  ;;  %v1811_v53 = vmax.f32 %v1785_v48, 0.0  ;;  %v3086_v62 = vld [vmem:[%s3651_s13 + $0x28] sm:$0xff]  }
 0x3d2   : > { %v1814_v2 = vmax.f32 %v1796_v50, 0.0  ;;  %2938 = vmatprep.subr.bf16.mxu0 %v3086_v62 }
 0x3d3   : > { %v1812_v54 = vmax.f32 %v1788_v43, 0.0  ;;  %2939 = vmatpush3.bf16.msra.mxu0 %v3086_v62 }
 0x3d4   : > { %v1822_v40 = vpack.c.bf16 %v1814_v2, %v1813_v1  ;;  %2940 = vmatprep.subr.bf16.mxu0 %v3087_v0 }
 0x3d5   : > { %v1821_v56 = vpack.c.bf16 %v1812_v54, %v1811_v53 }
 0x3d7   : > { %2892 = vmatprep.mubr.bf16.mxu0 %v1821_v56  ;;  %2941 = vmatpush3.bf16.msra.mxu0 %v3087_v0 }
 0x3d8   : > { %2893 = vmatmul.mubr.bf16.gmra.mrb[76].mxu0 %v1822_v40 }
 0x47b   : > { %v2882_v3 = vpop.f32.mrb[64].mxu0 }
 0x47c   : > { %v1937_v4 = vadd.f32 %v2882_v3, %v3583_v63  ;;  %v1928_v5 = vpop.f32.mrb[65].mxu0 }
 0x47d   : > { %v1929_v58 = vadd.f32 %v3583_v63, %v1928_v5  ;;  %v2883_v6 = vpop.f32.mrb[66].mxu0 }
 0x47e   : > { %v1940_v7 = vadd.f32 %v2883_v6, %v3583_v63  ;;  %v1931_v8 = vpop.f32.mrb[67].mxu0  ;;  %v1993_v10 = vmax.f32 %v1937_v4, 0.0 }
 0x47f   : > { %v1932_v9 = vadd.f32 %v3583_v63, %v1931_v8  ;;  %v1991_v12 = vmax.f32 %v1929_v58, 0.0 }
 0x480   : > { %v1994_v11 = vmax.f32 %v1940_v7, 0.0 }
 0x481   : > { %v1992_v13 = vmax.f32 %v1932_v9, 0.0 }
 0x482   : > { %v2008_v14 = vpack.c.bf16 %v1994_v11, %v1993_v10 }
 0x483   : > { %v2007_v15 = vpack.c.bf16 %v1992_v13, %v1991_v12 }
 0x485   : > { %2912 = vmatprep.mubr.bf16.mxu1 %v2007_v15 }
 0x486   : > { %2913 = vmatmul.mubr.bf16.vlgmr.msra.gmra.mrb[64].mxu1 %v2008_v14 }
 0x487   : > { %2968 = vmatpush3.bf16.msra.mxu1 %v3081_v51  ;;  %v3088_v51 = vld [vmem:[%s3651_s13 + $0x38] sm:$0xff]  }
 0x488   : > { %2961 = vmatprep.subr.bf16.mxu1 %v3082_v55  ;;  %2942 = vmatprep.subr.bf16.mxu0 %v3088_v51 }
 0x489   : > { %2943 = vmatpush3.bf16.msra.mxu0 %v3088_v51 }
 0x48b   : > { %v2886_v16 = vpop.f32.mrb[68].mxu0  ;;  %2969 = vmatpush3.bf16.msra.mxu1 %v3082_v55  ;;  %v2540_v55 = vld [vmem:[%s3650_s12] ss:$0 sm:$0xff] }
 0x48c   : > { %v1953_v17 = vadd.f32 %v2886_v16, %v3583_v63  ;;  %v1944_v18 = vpop.f32.mrb[69].mxu0  ;;  %2962 = vmatprep.subr.bf16.mxu1 %v3083_v59 }
 0x48d   : > { %v1945_v19 = vadd.f32 %v3583_v63, %v1944_v18  ;;  %v2887_v20 = vpop.f32.mrb[70].mxu0 }
 0x48e   : > { %v1956_v21 = vadd.f32 %v2887_v20, %v3583_v63  ;;  %v1947_v22 = vpop.f32.mrb[71].mxu0  ;;  %v1997_v24 = vmax.f32 %v1953_v17, 0.0 }
 0x48f   : > { %v1948_v23 = vadd.f32 %v3583_v63, %v1947_v22  ;;  %2970 = vmatpush3.bf16.msra.mxu1 %v3083_v59  ;;  %v1995_v26 = vmax.f32 %v1945_v19, 0.0 }
 0x490   : > { %v1998_v25 = vmax.f32 %v1956_v21, 0.0  ;;  %2963 = vmatprep.subr.bf16.mxu1 %v3084_v60 }
 0x491   : > { %v1996_v27 = vmax.f32 %v1948_v23, 0.0 }
 0x492   : > { %v2010_v28 = vpack.c.bf16 %v1998_v25, %v1997_v24 }
 0x493   : > { %v2009_v29 = vpack.c.bf16 %v1996_v27, %v1995_v26  ;;  %2971 = vmatpush3.bf16.msra.mxu1 %v3084_v60 }
 0x494   : > { %2964 = vmatprep.subr.bf16.mxu1 %v3085_v61 }
 0x495   : > { %2916 = vmatprep.mubr.bf16.mxu1 %v2009_v29 }
 0x496   : > { %2917 = vmatmul.mubr.bf16.gmra.mrb[68].mxu1 %v2010_v28 }
 0x497   : > { %2972 = vmatpush3.bf16.msra.mxu1 %v3085_v61 }
 0x498   : > { %2965 = vmatprep.subr.bf16.mxu1 %v3086_v62 }
 0x49b   : > { %v2890_v30 = vpop.f32.mrb[72].mxu0  ;;  %2973 = vmatpush3.bf16.msra.mxu1 %v3086_v62 }
 0x49c   : > { %v1969_v31 = vadd.f32 %v2890_v30, %v3583_v63  ;;  %v1960_v33 = vpop.f32.mrb[73].mxu0  ;;  %2966 = vmatprep.subr.bf16.mxu1 %v3087_v0 }
 0x49d   : > { %v1961_v34 = vadd.f32 %v3583_v63, %v1960_v33  ;;  %v2891_v35 = vpop.f32.mrb[74].mxu0 }
 0x49e   : > { %v1972_v36 = vadd.f32 %v2891_v35, %v3583_v63  ;;  %v1963_v37 = vpop.f32.mrb[75].mxu0  ;;  %v2001_v41 = vmax.f32 %v1969_v31, 0.0 }
 0x49f   : > { %v1964_v38 = vadd.f32 %v3583_v63, %v1963_v37  ;;  %v1999_v42 = vmax.f32 %v1961_v34, 0.0  ;;  %2974 = vmatpush3.bf16.msra.mxu1 %v3087_v0 }
 0x4a0   : > { %v2002_v32 = vmax.f32 %v1972_v36, 0.0  ;;  %2967 = vmatprep.subr.bf16.mxu1 %v3088_v51 }
 0x4a1   : > { %v2000_v44 = vmax.f32 %v1964_v38, 0.0 }
 0x4a2   : > { %v2012_v45 = vpack.c.bf16 %v2002_v32, %v2001_v41 }
 0x4a3   : > { %v2011_v39 = vpack.c.bf16 %v2000_v44, %v1999_v42  ;;  %2975 = vmatpush3.bf16.msra.mxu1 %v3088_v51 }
 0x4a5   : > { %2920 = vmatprep.mubr.bf16.mxu1 %v2011_v39 }
 0x4a6   : > { %2921 = vmatmul.mubr.bf16.gmra.mrb[72].mxu1 %v2012_v45 }
 0x4ab   : > { %v2894_v46 = vpop.f32.mrb[76].mxu0 }
 0x4ac   : > { %v1985_v47 = vadd.f32 %v2894_v46, %v3583_v63  ;;  %v1976_v48 = vpop.f32.mrb[77].mxu0 }
 0x4ad   : > { %v1977_v49 = vadd.f32 %v3583_v63, %v1976_v48  ;;  %v2895_v50 = vpop.f32.mrb[78].mxu0 }
 0x4ae   : > { %v1988_v52 = vadd.f32 %v2895_v50, %v3583_v63  ;;  %v1979_v43 = vpop.f32.mrb[79].mxu0  ;;  %v2005_v2 = vmax.f32 %v1985_v47, 0.0 }
 0x4af   : > { %v1980_v1 = vadd.f32 %v3583_v63, %v1979_v43  ;;  %v2003_v54 = vmax.f32 %v1977_v49, 0.0 }
 0x4b0   : > { %v2006_v53 = vmax.f32 %v1988_v52, 0.0 }
 0x4b1   : > { %v2004_v40 = vmax.f32 %v1980_v1, 0.0 }
 0x4b2   : > { %v2014_v56 = vpack.c.bf16 %v2006_v53, %v2005_v2  ;;  %v2549_v53 = vld [vmem:[%s3652_s14] ss:$0 sm:$0xff] }
 0x4b3   : > { %v2013_v57 = vpack.c.bf16 %v2004_v40, %v2003_v54 }
 0x4b5   : > { %2924 = vmatprep.mubr.bf16.mxu1 %v2013_v57 }
 0x4b6   : > { %2925 = vmatmul.mubr.bf16.gmra.mrb[76].mxu1 %v2014_v56 }
 0x559   : > { %v2914_v59 = vpop.f32.mrb[64].mxu1 }
 0x55a   : > { %v2129_v60 = vadd.f32 %v2914_v59, %v2540_v55  ;;  %v2120_v61 = vpop.f32.mrb[65].mxu1 }
 0x55b   : > { %v2121_v62 = vadd.f32 %v2540_v55, %v2120_v61  ;;  %v2915_v63 = vpop.f32.mrb[66].mxu1 }
 0x55c   : > { %v2132_v3 = vadd.f32 %v2915_v63, %v2540_v55  ;;  %v2123_v4 = vpop.f32.mrb[67].mxu1  ;;  %v2185_v58 = vmax.f32 %v2129_v60, 0.0 }
 0x55d   : > { %v2124_v5 = vadd.f32 %v2540_v55, %v2123_v4  ;;  %v2183_v7 = vmax.f32 %v2121_v62, 0.0 }
 0x55e   : > { %v2186_v6 = vmax.f32 %v2132_v3, 0.0 }
 0x55f   : > { %v2184_v8 = vmax.f32 %v2124_v5, 0.0 }
 0x560   : > { %v2200_v9 = vpack.c.bf16 %v2186_v6, %v2185_v58 }
 0x561   : > { %v2199_v10 = vpack.c.bf16 %v2184_v8, %v2183_v7 }
 0x563   : > { %2944 = vmatprep.mubr.bf16.mxu0 %v2199_v10 }
 0x564   : > { %2945 = vmatmul.mubr.bf16.vlgmr.msra.gmra.mrb[80].mxu0 %v2200_v9 }
 0x569   : > { %v2918_v11 = vpop.f32.mrb[68].mxu1 }
 0x56a   : > { %v2145_v12 = vadd.f32 %v2918_v11, %v2540_v55  ;;  %v2136_v13 = vpop.f32.mrb[69].mxu1 }
 0x56b   : > { %v2137_v14 = vadd.f32 %v2540_v55, %v2136_v13  ;;  %v2919_v15 = vpop.f32.mrb[70].mxu1 }
 0x56c   : > { %v2148_v16 = vadd.f32 %v2919_v15, %v2540_v55  ;;  %v2139_v17 = vpop.f32.mrb[71].mxu1  ;;  %v2189_v19 = vmax.f32 %v2145_v12, 0.0 }
 0x56d   : > { %v2140_v18 = vadd.f32 %v2540_v55, %v2139_v17  ;;  %v2187_v21 = vmax.f32 %v2137_v14, 0.0 }
 0x56e   : > { %v2190_v20 = vmax.f32 %v2148_v16, 0.0 }
 0x56f   : > { %v2188_v22 = vmax.f32 %v2140_v18, 0.0 }
 0x570   : > { %v2202_v23 = vpack.c.bf16 %v2190_v20, %v2189_v19 }
 0x571   : > { %v2201_v24 = vpack.c.bf16 %v2188_v22, %v2187_v21 }
 0x573   : > { %2948 = vmatprep.mubr.bf16.mxu0 %v2201_v24 }
 0x574   : > { %2949 = vmatmul.mubr.bf16.gmra.mrb[84].mxu0 %v2202_v23 }
 0x579   : > { %v2922_v25 = vpop.f32.mrb[72].mxu1 }
 0x57a   : > { %v2161_v26 = vadd.f32 %v2922_v25, %v2540_v55  ;;  %v2152_v27 = vpop.f32.mrb[73].mxu1 }
 0x57b   : > { %v2153_v28 = vadd.f32 %v2540_v55, %v2152_v27  ;;  %v2923_v29 = vpop.f32.mrb[74].mxu1 }
 0x57c   : > { %v2164_v30 = vadd.f32 %v2923_v29, %v2540_v55  ;;  %v2155_v31 = vpop.f32.mrb[75].mxu1  ;;  %v2193_v34 = vmax.f32 %v2161_v26, 0.0 }
 0x57d   : > { %v2156_v33 = vadd.f32 %v2540_v55, %v2155_v31  ;;  %v2191_v36 = vmax.f32 %v2153_v28, 0.0 }
 0x57e   : > { %v2194_v35 = vmax.f32 %v2164_v30, 0.0 }
 0x57f   : > { %v2192_v37 = vmax.f32 %v2156_v33, 0.0 }
 0x580   : > { %v2204_v38 = vpack.c.bf16 %v2194_v35, %v2193_v34 }
 0x581   : > { %v2203_v41 = vpack.c.bf16 %v2192_v37, %v2191_v36 }
 0x583   : > { %2952 = vmatprep.mubr.bf16.mxu1 %v2203_v41 }
 0x584   : > { %2953 = vmatmul.mubr.bf16.vlgmr.msra.gmra.mrb[80].mxu1 %v2204_v38 }
 0x589   : > { %v2926_v32 = vpop.f32.mrb[76].mxu1 }
 0x58a   : > { %v2177_v42 = vadd.f32 %v2926_v32, %v2540_v55  ;;  %v2168_v44 = vpop.f32.mrb[77].mxu1 }
 0x58b   : > { %v2169_v45 = vadd.f32 %v2540_v55, %v2168_v44  ;;  %v2927_v39 = vpop.f32.mrb[78].mxu1 }
 0x58c   : > { %v2180_v46 = vadd.f32 %v2927_v39, %v2540_v55  ;;  %v2171_v47 = vpop.f32.mrb[79].mxu1  ;;  %v2197_v49 = vmax.f32 %v2177_v42, 0.0 }
 0x58d   : > { %v2172_v48 = vadd.f32 %v2540_v55, %v2171_v47  ;;  %v2195_v52 = vmax.f32 %v2169_v45, 0.0 }
 0x58e   : > { %v2198_v50 = vmax.f32 %v2180_v46, 0.0 }
 0x58f   : > { %v2196_v43 = vmax.f32 %v2172_v48, 0.0 }
 0x590   : > { %v2206_v1 = vpack.c.bf16 %v2198_v50, %v2197_v49 }
 0x591   : > { %v2205_v2 = vpack.c.bf16 %v2196_v43, %v2195_v52 }
 0x593   : > { %2956 = vmatprep.mubr.bf16.mxu1 %v2205_v2 }
 0x594   : > { %2957 = vmatmul.mubr.bf16.gmra.mrb[84].mxu1 %v2206_v1 }
 0x637   : > { %v2946_v54 = vpop.f32.mrb[80].mxu0 }
 0x638   : > { %v2321_v40 = vadd.f32 %v2946_v54, %v2549_v53  ;;  %v2312_v56 = vpop.f32.mrb[81].mxu0 }
 0x639   : > { %v2313_v57 = vadd.f32 %v2549_v53, %v2312_v56  ;;  %v2947_v0 = vpop.f32.mrb[82].mxu0 }
 0x63a   : > { %2377 = vst [vmem:[%s3617_s26 + $0x10] sm:$0xff] %v2321_v40  ;;  %v2324_v51 = vadd.f32 %v2947_v0, %v2549_v53  ;;  %v2315_v55 = vpop.f32.mrb[83].mxu0 }
 0x63b   : > { %2375 = vst [vmem:[%s3617_s26] sm:$0xff] %v2313_v57  ;;  %v2316_v59 = vadd.f32 %v2549_v53, %v2315_v55 }
 0x63c   : > { %2378 = vst [vmem:[%s3617_s26 + $0x18] sm:$0xff] %v2324_v51 }
 0x63d   : > { %2376 = vst [vmem:[%s3617_s26 + $0x8] sm:$0xff] %v2316_v59 }
 0x647   : > { %v2950_v60 = vpop.f32.mrb[84].mxu0 }
 0x648   : > { %v2337_v61 = vadd.f32 %v2950_v60, %v2549_v53  ;;  %v2328_v62 = vpop.f32.mrb[85].mxu0 }
 0x649   : > { %v2329_v63 = vadd.f32 %v2549_v53, %v2328_v62  ;;  %v2951_v3 = vpop.f32.mrb[86].mxu0 }
 0x64a   : > { %2381 = vst [vmem:[%s3617_s26 + $0x30] sm:$0xff] %v2337_v61  ;;  %v2340_v4 = vadd.f32 %v2951_v3, %v2549_v53  ;;  %v2331_v5 = vpop.f32.mrb[87].mxu0 }
 0x64b   : > { %2379 = vst [vmem:[%s3617_s26 + $0x20] sm:$0xff] %v2329_v63  ;;  %v2332_v58 = vadd.f32 %v2549_v53, %v2331_v5 }
 0x64c   : > { %2382 = vst [vmem:[%s3617_s26 + $0x38] sm:$0xff] %v2340_v4 }
 0x64d   : > { %2380 = vst [vmem:[%s3617_s26 + $0x28] sm:$0xff] %v2332_v58 }
 0x657   : > { %v2954_v6 = vpop.f32.mrb[80].mxu1 }
 0x658   : > { %v2353_v7 = vadd.f32 %v2954_v6, %v2549_v53  ;;  %v2344_v8 = vpop.f32.mrb[81].mxu1 }
 0x659   : > { %v2345_v9 = vadd.f32 %v2549_v53, %v2344_v8  ;;  %v2955_v10 = vpop.f32.mrb[82].mxu1 }
 0x65a   : > { %2385 = vst [vmem:[%s3617_s26 + $0x50] sm:$0xff] %v2353_v7  ;;  %v2356_v11 = vadd.f32 %v2955_v10, %v2549_v53  ;;  %v2347_v12 = vpop.f32.mrb[83].mxu1 }
 0x65b   : > { %2383 = vst [vmem:[%s3617_s26 + $0x40] sm:$0xff] %v2345_v9  ;;  %v2348_v13 = vadd.f32 %v2549_v53, %v2347_v12 }
 0x65c   : > { %2386 = vst [vmem:[%s3617_s26 + $0x58] sm:$0xff] %v2356_v11 }
 0x65d   : > { %2384 = vst [vmem:[%s3617_s26 + $0x48] sm:$0xff] %v2348_v13 }
 0x667   : > { %v2958_v14 = vpop.f32.mrb[84].mxu1 }
 0x668   : > { %v2369_v15 = vadd.f32 %v2958_v14, %v2549_v53  ;;  %v2360_v16 = vpop.f32.mrb[85].mxu1 }
 0x669   : > { %v2361_v17 = vadd.f32 %v2549_v53, %v2360_v16  ;;  %v2959_v18 = vpop.f32.mrb[86].mxu1 }
 0x66a   : > { %2389 = vst [vmem:[%s3617_s26 + $0x70] sm:$0xff] %v2369_v15  ;;  %v2372_v19 = vadd.f32 %v2959_v18, %v2549_v53  ;;  %v2363_v20 = vpop.f32.mrb[87].mxu1 }
 0x66b   : > { %2387 = vst [vmem:[%s3617_s26 + $0x60] sm:$0xff] %v2361_v17  ;;  %v2364_v21 = vadd.f32 %v2549_v53, %v2363_v20 }
 0x66c   : > { %2390 = vst [vmem:[%s3617_s26 + $0x78] sm:$0xff] %v2372_v19 }
 0x66d   : > { %2388 = vst [vmem:[%s3617_s26 + $0x68] sm:$0xff] %v2364_v21 }
 0x66e PF: > { %s25_s18 = sadd.s32 1, %s3095_s18  }
 0x66f   : > { %p22_p4 = scmp.ge.s32.totalorder %s25_s18, 4  }
 0x671   :  { %24 = sbr.rel (!%p22_p4) target bundleno = 1 (0x1), region = 110 }

</bundles_post_ra>
